<compile_context>
chip_gen: v5e
topology: v5e:2x2
jax: 0.10.0
libtpu: 0.0.40
codegen_flags: <defaults>
</compile_context>

<pallas_src>
import jax
import jax.numpy as jnp
from jax.experimental import pallas as pl
from jax.experimental.pallas import tpu as pltpu

# ---------------- configuration ---------------------------------------------
B = 256                     # batch (two 128-row tiles -> both v7x cores busy)
TB = 128                    # batch tile == MXU row width
IN_DIM = 32                 # encoder input dim
INTERMEDIATE_DIMS = [64, 64]
Z_DIM = 16                  # latent dim
DEC_HIDDEN = 64             # decoder hidden width
OUT_SIZE = IN_DIM           # decoder reconstructs the input dim
N_DOUBLE = len(INTERMEDIATE_DIMS)
P = 128                     # lane-padded feature width used everywhere
NW = 2 * N_DOUBLE + 1 + 2   # 7 weight matrices (4 enc + 1 fused head + 2 dec)

assert B % TB == 0


# ---------------- Pallas kernel ----------------------------------------------
def vae_kernel(x_ref, eps_ref, w_ref, b_ref, out_ref):
    """Whole VAE forward for one batch tile.

    x_ref   : (TB, P)  f32, input padded with zeros beyond IN_DIM lanes
    eps_ref : (TB, P)  f32, N(0,1) noise placed at lanes [Z_DIM, 2*Z_DIM)
    w_ref   : (NW, P, P) f32 zero-padded weight slab
    b_ref   : (NW, P)    f32 zero-padded bias slab
    out_ref : (2, TB, P) f32; [0]=x_hat (lanes<OUT_SIZE), [1]=[mu|log_var]
    """
    h = x_ref[...]                                     # (TB, P), f32

    # --- encoder: DoubleLayer stack (resnet=True, batch_norm=False) ----------
    wi = 0
    for _ in range(N_DOUBLE):
        out1 = jnp.maximum(
            jnp.dot(h, w_ref[wi], preferred_element_type=jnp.float32)
            + b_ref[pl.ds(wi, 1), :], 0.0)
        out2 = jnp.maximum(
            jnp.dot(out1, w_ref[wi + 1], preferred_element_type=jnp.float32)
            + b_ref[pl.ds(wi + 1, 1), :], 0.0)
        h = out2 + out1                                # residual: out2 += out1
        wi += 2

    # --- fused encoder head: lanes [0,Z)=mu, [Z,2Z)=log_var, rest 0 ----------
    head = (jnp.dot(h, w_ref[wi], preferred_element_type=jnp.float32)
            + b_ref[pl.ds(wi, 1), :])
    wi += 1

    # --- reparameterization, expressed in lanes -------------------------------
    # v lanes [0,Z) = mu ; lanes [Z,2Z) = exp(0.5*log_var)*eps ; rest 0.
    lane = jax.lax.broadcasted_iota(jnp.int32, head.shape, 1)
    v = jnp.where(lane < Z_DIM, head, jnp.exp(0.5 * head) * eps_ref[...])

    # --- decoder: Linear -> ReLU -> Linear ------------------------------------
    # w_ref[wi] holds Wd1 duplicated in row ranges [0,Z) and [Z,2Z), so
    # v @ w_ref[wi] == (mu + exp(0.5*log_var)*eps) @ Wd1 == z @ Wd1.
    d1 = jnp.maximum(
        jnp.dot(v, w_ref[wi], preferred_element_type=jnp.float32)
        + b_ref[pl.ds(wi, 1), :], 0.0)
    wi += 1
    x_hat = (jnp.dot(d1, w_ref[wi], preferred_element_type=jnp.float32)
             + b_ref[pl.ds(wi, 1), :])

    out_ref[0] = x_hat                                 # lanes >= OUT_SIZE are 0
    out_ref[1] = head                                  # [mu | log_var | 0...]


# ---------------- parameter construction (deterministic) ---------------------
def init_params(key):
    """Unpadded Linear weights stored as (in, out) so kernels compute x@W + b."""
    params = []
    dims = [IN_DIM] + INTERMEDIATE_DIMS
    k = key

    def linear(k, fan_in, fan_out):
        k, kw, kb = jax.random.split(k, 3)
        bound = 1.0 / jnp.sqrt(fan_in)
        w = jax.random.uniform(kw, (fan_in, fan_out), jnp.float32, -bound, bound)
        b = jax.random.uniform(kb, (1, fan_out), jnp.float32, -bound, bound)
        return k, w, b

    for i in range(len(dims) - 1):                       # encoder DoubleLayers
        in_d, out_d = dims[i], dims[i + 1]
        k, w1, b1 = linear(k, in_d, out_d)
        k, w2, b2 = linear(k, out_d, out_d)
        params += [w1, b1, w2, b2]
    k, wmu, bmu = linear(k, dims[-1], Z_DIM)             # mu / log_var heads
    k, wlv, blv = linear(k, dims[-1], Z_DIM)
    params += [wmu, bmu, wlv, blv]
    k, wd1, bd1 = linear(k, Z_DIM, DEC_HIDDEN)           # decoder
    k, wd2, bd2 = linear(k, DEC_HIDDEN, OUT_SIZE)
    params += [wd1, bd1, wd2, bd2]
    return params


def pack_params(params):
    """Pack 18 small arrays into one weight slab and one bias slab."""
    ws, bs = [], []
    idx = 0
    for _ in range(N_DOUBLE):
        w1, b1, w2, b2 = params[idx:idx + 4]
        idx += 4
        ws += [w1, w2]
        bs += [b1, b2]
    wmu, bmu, wlv, blv = params[idx:idx + 4]
    idx += 4
    ws.append(jnp.concatenate([wmu, wlv], axis=1))       # fused head (64, 32)
    bs.append(jnp.concatenate([bmu, blv], axis=1))       # fused bias (1, 32)
    wd1, bd1, wd2, bd2 = params[idx:idx + 4]
    ws.append(jnp.concatenate([wd1, wd1], axis=0))       # Wd1 duplicated rows
    bs.append(bd1)
    ws.append(wd2)
    bs.append(bd2)

    w_slab = jnp.zeros((NW, P, P), jnp.float32)
    b_slab = jnp.zeros((NW, P), jnp.float32)
    for j, w in enumerate(ws):
        w_slab = w_slab.at[j, :w.shape[0], :w.shape[1]].set(w)
    for j, b in enumerate(bs):
        b_slab = b_slab.at[j, :b.shape[1]].set(b[0])
    return w_slab, b_slab


# ---------------- wrapper -----------------------------------------------------
@jax.jit
def vae_forward(x, eps, w_slab, b_slab):
    bsz = x.shape[0]
    # lane-pad inputs: x -> lanes [0, IN_DIM), eps -> lanes [Z_DIM, 2*Z_DIM)
    x_pad = jnp.pad(x, ((0, 0), (0, P - IN_DIM)))
    eps_pad = jnp.pad(eps, ((0, 0), (Z_DIM, P - 2 * Z_DIM)))

    out = pl.pallas_call(
        vae_kernel,
        out_shape=jax.ShapeDtypeStruct((2, bsz, P), jnp.float32),
        grid=(bsz // TB,),
        in_specs=[
            pl.BlockSpec((TB, P), lambda i: (i, 0)),          # x
            pl.BlockSpec((TB, P), lambda i: (i, 0)),          # eps
            pl.BlockSpec((NW, P, P), lambda i: (0, 0, 0)),    # weight slab
            pl.BlockSpec((NW, P), lambda i: (0, 0)),          # bias slab
        ],
        out_specs=pl.BlockSpec((2, TB, P), lambda i: (0, i, 0)),
        compiler_params=pltpu.CompilerParams(
            dimension_semantics=("parallel",)),
    )(x_pad, eps_pad, w_slab, b_slab)

    x_hat = out[0, :, :OUT_SIZE]
    mu = out[1, :, :Z_DIM]
    log_var = out[1, :, Z_DIM:2 * Z_DIM]
    return x_hat, mu, log_var


# ---------------- reference (plain JAX) for a quick sanity check -------------
def vae_reference(x, eps, params):
    h = x
    idx = 0
    for _ in range(N_DOUBLE):
        w1, b1, w2, b2 = params[idx:idx + 4]
        idx += 4
        out1 = jnp.maximum(h @ w1 + b1, 0.0)
        out2 = jnp.maximum(out1 @ w2 + b2, 0.0)
        h = out2 + out1
    wmu, bmu, wlv, blv = params[idx:idx + 4]
    idx += 4
    mu = h @ wmu + bmu
    log_var = h @ wlv + blv
    z = mu + jnp.exp(0.5 * log_var) * eps
    wd1, bd1, wd2, bd2 = params[idx:idx + 4]
    d1 = jnp.maximum(z @ wd1 + bd1, 0.0)
    x_hat = d1 @ wd2 + bd2
    return x_hat, mu, log_var


# ---------------- main --------------------------------------------------------
if __name__ == "__main__":
    key = jax.random.PRNGKey(0)
    k_x, k_eps, k_p = jax.random.split(key, 3)

    x = jax.random.normal(k_x, (B, IN_DIM), jnp.float32)
    # epsilon ~ N(0,1), drawn outside the kernel (torch.randn_like equivalent)
    eps = jax.random.normal(k_eps, (B, Z_DIM), jnp.float32)

    params = init_params(k_p)
    w_slab, b_slab = pack_params(params)

    x_hat, mu, log_var = vae_forward(x, eps, w_slab, b_slab)
    jax.block_until_ready((x_hat, mu, log_var))

    # numerical sanity check against the plain-JAX reference
    x_hat_ref, mu_ref, log_var_ref = vae_reference(x, eps, params)
    assert jnp.allclose(x_hat, x_hat_ref, atol=1e-3, rtol=1e-3)
    assert jnp.allclose(mu, mu_ref, atol=1e-3, rtol=1e-3)
    assert jnp.allclose(log_var, log_var_ref, atol=1e-3, rtol=1e-3)

    print("KERNEL_OK")
</pallas_src>

<mosaic_0001>
module attributes {stable_mosaic.version = 11 : i64} {
  func.func @vae_kernel(%arg0: i32, %arg1: memref<128x128xf32, #tpu.memory_space<vmem>>, %arg2: memref<128x128xf32, #tpu.memory_space<vmem>>, %arg3: memref<7x128x128xf32, #tpu.memory_space<vmem>>, %arg4: memref<7x128xf32, #tpu.memory_space<vmem>>, %arg5: memref<2x128x128xf32, #tpu.memory_space<vmem>>) attributes {dimension_semantics = [#tpu.dimension_semantics<parallel>], iteration_bounds = array<i64: 2>, scalar_prefetch = 0 : i64, scratch_operands = 0 : i64, tpu.core_type = #tpu.core_type<tc>, window_params = [{transform_indices = @transform_0, window_bounds = array<i64: 128, 128>}, {transform_indices = @transform_1, window_bounds = array<i64: 128, 128>}, {pipeline_mode = #tpu.pipeline_mode<synchronous>, transform_indices = @transform_2, window_bounds = array<i64: 7, 128, 128>}, {pipeline_mode = #tpu.pipeline_mode<synchronous>, transform_indices = @transform_3, window_bounds = array<i64: 7, 128>}, {transform_indices = @transform_4, window_bounds = array<i64: 2, 128, 128>}]} {
    %c0 = arith.constant 0 : index
    %c0_0 = arith.constant 0 : index
    %0 = vector.load %arg1[%c0, %c0_0] : memref<128x128xf32, #tpu.memory_space<vmem>>, vector<128x128xf32>
    %c0_1 = arith.constant 0 : index
    %c0_2 = arith.constant 0 : index
    %c0_3 = arith.constant 0 : index
    %1 = vector.load %arg3[%c0_1, %c0_2, %c0_3] : memref<7x128x128xf32, #tpu.memory_space<vmem>>, vector<1x128x128xf32>
    %2 = vector.shape_cast %1 : vector<1x128x128xf32> to vector<128x128xf32>
    %cst = arith.constant dense<0.000000e+00> : vector<128x128xf32>
    %3 = tpu.matmul %0, %2, %cst {dimension_numbers = #tpu.dot_dimension_numbers<[1], [0], [0], [1], [0, 0, 1, 1], [], []>} : vector<128x128xf32>, vector<128x128xf32>, vector<128x128xf32> -> vector<128x128xf32>
    %c0_4 = arith.constant 0 : index
    %c0_5 = arith.constant 0 : index
    %4 = vector.load %arg4[%c0_4, %c0_5] : memref<7x128xf32, #tpu.memory_space<vmem>>, vector<1x128xf32>
    %5 = vector.broadcast %4 : vector<1x128xf32> to vector<128x128xf32>
    %6 = arith.addf %3, %5 : vector<128x128xf32>
    %cst_6 = arith.constant 0.000000e+00 : f32
    %7 = vector.broadcast %cst_6 : f32 to vector<128x128xf32>
    %8 = arith.maximumf %6, %7 : vector<128x128xf32>
    %c1 = arith.constant 1 : index
    %c0_7 = arith.constant 0 : index
    %c0_8 = arith.constant 0 : index
    %9 = vector.load %arg3[%c1, %c0_7, %c0_8] : memref<7x128x128xf32, #tpu.memory_space<vmem>>, vector<1x128x128xf32>
    %10 = vector.shape_cast %9 : vector<1x128x128xf32> to vector<128x128xf32>
    %cst_9 = arith.constant dense<0.000000e+00> : vector<128x128xf32>
    %11 = tpu.matmul %8, %10, %cst_9 {dimension_numbers = #tpu.dot_dimension_numbers<[1], [0], [0], [1], [0, 0, 1, 1], [], []>} : vector<128x128xf32>, vector<128x128xf32>, vector<128x128xf32> -> vector<128x128xf32>
    %c1_10 = arith.constant 1 : index
    %c0_11 = arith.constant 0 : index
    %12 = vector.load %arg4[%c1_10, %c0_11] : memref<7x128xf32, #tpu.memory_space<vmem>>, vector<1x128xf32>
    %13 = vector.broadcast %12 : vector<1x128xf32> to vector<128x128xf32>
    %14 = arith.addf %11, %13 : vector<128x128xf32>
    %cst_12 = arith.constant 0.000000e+00 : f32
    %15 = vector.broadcast %cst_12 : f32 to vector<128x128xf32>
    %16 = arith.maximumf %14, %15 : vector<128x128xf32>
    %17 = arith.addf %16, %8 : vector<128x128xf32>
    %c2 = arith.constant 2 : index
    %c0_13 = arith.constant 0 : index
    %c0_14 = arith.constant 0 : index
    %18 = vector.load %arg3[%c2, %c0_13, %c0_14] : memref<7x128x128xf32, #tpu.memory_space<vmem>>, vector<1x128x128xf32>
    %19 = vector.shape_cast %18 : vector<1x128x128xf32> to vector<128x128xf32>
    %cst_15 = arith.constant dense<0.000000e+00> : vector<128x128xf32>
    %20 = tpu.matmul %17, %19, %cst_15 {dimension_numbers = #tpu.dot_dimension_numbers<[1], [0], [0], [1], [0, 0, 1, 1], [], []>} : vector<128x128xf32>, vector<128x128xf32>, vector<128x128xf32> -> vector<128x128xf32>
    %c2_16 = arith.constant 2 : index
    %c0_17 = arith.constant 0 : index
    %21 = vector.load %arg4[%c2_16, %c0_17] : memref<7x128xf32, #tpu.memory_space<vmem>>, vector<1x128xf32>
    %22 = vector.broadcast %21 : vector<1x128xf32> to vector<128x128xf32>
    %23 = arith.addf %20, %22 : vector<128x128xf32>
    %cst_18 = arith.constant 0.000000e+00 : f32
    %24 = vector.broadcast %cst_18 : f32 to vector<128x128xf32>
    %25 = arith.maximumf %23, %24 : vector<128x128xf32>
    %c3 = arith.constant 3 : index
    %c0_19 = arith.constant 0 : index
    %c0_20 = arith.constant 0 : index
    %26 = vector.load %arg3[%c3, %c0_19, %c0_20] : memref<7x128x128xf32, #tpu.memory_space<vmem>>, vector<1x128x128xf32>
    %27 = vector.shape_cast %26 : vector<1x128x128xf32> to vector<128x128xf32>
    %cst_21 = arith.constant dense<0.000000e+00> : vector<128x128xf32>
    %28 = tpu.matmul %25, %27, %cst_21 {dimension_numbers = #tpu.dot_dimension_numbers<[1], [0], [0], [1], [0, 0, 1, 1], [], []>} : vector<128x128xf32>, vector<128x128xf32>, vector<128x128xf32> -> vector<128x128xf32>
    %c3_22 = arith.constant 3 : index
    %c0_23 = arith.constant 0 : index
    %29 = vector.load %arg4[%c3_22, %c0_23] : memref<7x128xf32, #tpu.memory_space<vmem>>, vector<1x128xf32>
    %30 = vector.broadcast %29 : vector<1x128xf32> to vector<128x128xf32>
    %31 = arith.addf %28, %30 : vector<128x128xf32>
    %cst_24 = arith.constant 0.000000e+00 : f32
    %32 = vector.broadcast %cst_24 : f32 to vector<128x128xf32>
    %33 = arith.maximumf %31, %32 : vector<128x128xf32>
    %34 = arith.addf %33, %25 : vector<128x128xf32>
    %c4 = arith.constant 4 : index
    %c0_25 = arith.constant 0 : index
    %c0_26 = arith.constant 0 : index
    %35 = vector.load %arg3[%c4, %c0_25, %c0_26] : memref<7x128x128xf32, #tpu.memory_space<vmem>>, vector<1x128x128xf32>
    %36 = vector.shape_cast %35 : vector<1x128x128xf32> to vector<128x128xf32>
    %cst_27 = arith.constant dense<0.000000e+00> : vector<128x128xf32>
    %37 = tpu.matmul %34, %36, %cst_27 {dimension_numbers = #tpu.dot_dimension_numbers<[1], [0], [0], [1], [0, 0, 1, 1], [], []>} : vector<128x128xf32>, vector<128x128xf32>, vector<128x128xf32> -> vector<128x128xf32>
    %c4_28 = arith.constant 4 : index
    %c0_29 = arith.constant 0 : index
    %38 = vector.load %arg4[%c4_28, %c0_29] : memref<7x128xf32, #tpu.memory_space<vmem>>, vector<1x128xf32>
    %39 = vector.broadcast %38 : vector<1x128xf32> to vector<128x128xf32>
    %40 = arith.addf %37, %39 : vector<128x128xf32>
    %41 = tpu.iota {dimensions = array<i32: 1>} : vector<128x128xi32>
    %c16_i32 = arith.constant 16 : i32
    %42 = vector.broadcast %c16_i32 : i32 to vector<128x128xi32>
    %43 = arith.cmpi slt, %41, %42 : vector<128x128xi32>
    %cst_30 = arith.constant 5.000000e-01 : f32
    %44 = vector.broadcast %cst_30 : f32 to vector<128x128xf32>
    %45 = arith.mulf %44, %40 : vector<128x128xf32>
    %46 = math.exp %45 : vector<128x128xf32>
    %c0_31 = arith.constant 0 : index
    %c0_32 = arith.constant 0 : index
    %47 = vector.load %arg2[%c0_31, %c0_32] : memref<128x128xf32, #tpu.memory_space<vmem>>, vector<128x128xf32>
    %48 = arith.mulf %46, %47 : vector<128x128xf32>
    %49 = arith.select %43, %40, %48 : vector<128x128xi1>, vector<128x128xf32>
    %c5 = arith.constant 5 : index
    %c0_33 = arith.constant 0 : index
    %c0_34 = arith.constant 0 : index
    %50 = vector.load %arg3[%c5, %c0_33, %c0_34] : memref<7x128x128xf32, #tpu.memory_space<vmem>>, vector<1x128x128xf32>
    %51 = vector.shape_cast %50 : vector<1x128x128xf32> to vector<128x128xf32>
    %cst_35 = arith.constant dense<0.000000e+00> : vector<128x128xf32>
    %52 = tpu.matmul %49, %51, %cst_35 {dimension_numbers = #tpu.dot_dimension_numbers<[1], [0], [0], [1], [0, 0, 1, 1], [], []>} : vector<128x128xf32>, vector<128x128xf32>, vector<128x128xf32> -> vector<128x128xf32>
    %c5_36 = arith.constant 5 : index
    %c0_37 = arith.constant 0 : index
    %53 = vector.load %arg4[%c5_36, %c0_37] : memref<7x128xf32, #tpu.memory_space<vmem>>, vector<1x128xf32>
    %54 = vector.broadcast %53 : vector<1x128xf32> to vector<128x128xf32>
    %55 = arith.addf %52, %54 : vector<128x128xf32>
    %cst_38 = arith.constant 0.000000e+00 : f32
    %56 = vector.broadcast %cst_38 : f32 to vector<128x128xf32>
    %57 = arith.maximumf %55, %56 : vector<128x128xf32>
    %c6 = arith.constant 6 : index
    %c0_39 = arith.constant 0 : index
    %c0_40 = arith.constant 0 : index
    %58 = vector.load %arg3[%c6, %c0_39, %c0_40] : memref<7x128x128xf32, #tpu.memory_space<vmem>>, vector<1x128x128xf32>
    %59 = vector.shape_cast %58 : vector<1x128x128xf32> to vector<128x128xf32>
    %cst_41 = arith.constant dense<0.000000e+00> : vector<128x128xf32>
    %60 = tpu.matmul %57, %59, %cst_41 {dimension_numbers = #tpu.dot_dimension_numbers<[1], [0], [0], [1], [0, 0, 1, 1], [], []>} : vector<128x128xf32>, vector<128x128xf32>, vector<128x128xf32> -> vector<128x128xf32>
    %c6_42 = arith.constant 6 : index
    %c0_43 = arith.constant 0 : index
    %61 = vector.load %arg4[%c6_42, %c0_43] : memref<7x128xf32, #tpu.memory_space<vmem>>, vector<1x128xf32>
    %62 = vector.broadcast %61 : vector<1x128xf32> to vector<128x128xf32>
    %63 = arith.addf %60, %62 : vector<128x128xf32>
    %c0_44 = arith.constant 0 : index
    %c0_45 = arith.constant 0 : index
    %c0_46 = arith.constant 0 : index
    %64 = vector.load %arg5[%c0_44, %c0_45, %c0_46] : memref<2x128x128xf32, #tpu.memory_space<vmem>>, vector<1x128x128xf32>
    %65 = vector.shape_cast %64 : vector<1x128x128xf32> to vector<128x128xf32>
    %66 = vector.shape_cast %63 : vector<128x128xf32> to vector<1x128x128xf32>
    tpu.vector_store %arg5[%c0_44, %c0_45, %c0_46], %66 {strides = array<i32>} : memref<2x128x128xf32, #tpu.memory_space<vmem>>, vector<1x128x128xf32>,
    %c1_47 = arith.constant 1 : index
    %c0_48 = arith.constant 0 : index
    %c0_49 = arith.constant 0 : index
    %67 = vector.load %arg5[%c1_47, %c0_48, %c0_49] : memref<2x128x128xf32, #tpu.memory_space<vmem>>, vector<1x128x128xf32>
    %68 = vector.shape_cast %67 : vector<1x128x128xf32> to vector<128x128xf32>
    %69 = vector.shape_cast %40 : vector<128x128xf32> to vector<1x128x128xf32>
    tpu.vector_store %arg5[%c1_47, %c0_48, %c0_49], %69 {strides = array<i32>} : memref<2x128x128xf32, #tpu.memory_space<vmem>>, vector<1x128x128xf32>,
    return
  }
  func.func @transform_0(%arg0: i32) -> (i32, i32) {
    %c0_i32 = arith.constant 0 : i32
    %c0_i32_0 = arith.constant 0 : i32
    return %arg0, %c0_i32 : i32, i32
  }
  func.func @transform_1(%arg0: i32) -> (i32, i32) {
    %c0_i32 = arith.constant 0 : i32
    %c0_i32_0 = arith.constant 0 : i32
    return %arg0, %c0_i32 : i32, i32
  }
  func.func @transform_2(%arg0: i32) -> (i32, i32, i32) {
    %c0_i32 = arith.constant 0 : i32
    %c0_i32_0 = arith.constant 0 : i32
    %c0_i32_1 = arith.constant 0 : i32
    %c0_i32_2 = arith.constant 0 : i32
    return %c0_i32, %c0_i32_0, %c0_i32_1 : i32, i32, i32
  }
  func.func @transform_3(%arg0: i32) -> (i32, i32) {
    %c0_i32 = arith.constant 0 : i32
    %c0_i32_0 = arith.constant 0 : i32
    %c0_i32_1 = arith.constant 0 : i32
    return %c0_i32, %c0_i32_0 : i32, i32
  }
  func.func @transform_4(%arg0: i32) -> (i32, i32, i32) {
    %c0_i32 = arith.constant 0 : i32
    %c0_i32_0 = arith.constant 0 : i32
    %c0_i32_1 = arith.constant 0 : i32
    return %c0_i32, %arg0, %c0_i32_0 : i32, i32, i32
  }
}

</mosaic_0001>

<bundles_post_ra>
// kernel: vae_forward.1
= control target key start
LH: loop header
LB: loop body
LE: loop exit
PB: predicated region body
PF: predicated region fallthrough
CT: control target
= control target key end

     0   :  { %s1581_s15 = smov 0   ;;  %s1583_s16 = smov 0   ;;  %s2483_s0 = inlined_call_operand.vmem [shape: f32[256,128], index: 0, kind: input, shape index: {}]   ;;  %s2484_s1 = inlined_call_operand.vmem [shape: f32[256,128], index: 1, kind: input, shape index: {}]   ;;  %s2485_s2 = inlined_call_operand.vmem [shape: f32[7,128,128], index: 2, kind: input, shape index: {}]   ;;  %s2486_s3 = inlined_call_operand.vmem [shape: f32[7,128], index: 3, kind: input, shape index: {}]   ;;  %s2487_s4 = inlined_call_operand.vmem [shape: f32[2,256,128], index: 4, kind: output, shape index: {}]  }
   0x1   :  { %s1585_s17 = smov 0  }
   0x2 LB: > { %s1594_s18 = sadd.s32 4294967295, %s1554_s17   ;;  %s1596_s19 = sadd.s32 1, %s1554_s17   ;;  %s1554_s17 = sphi %s1585_s17, %s2491_s17   ;;  %s1550_s16 = sphi %s1583_s16, %s2490_s16   ;;  %s1546_s15 = sphi %s1581_s15, %s2489_s15  }
   0x3   : > { %s112_s20 = ssub.s32 %s1554_s17, %s1596_s19  ;;  %s115_s21 = sadd.s32 1, %s1550_s16 }
   0x4   : > { %p113_p0 = scmp.eq.s32.totalorder %s112_s20, 0  ;;  %p125_p1 = scmp.ne.s32.totalorder %s1550_s16, %s1546_s15 }
   0x5   : > { %p126_p2 = scmp.eq.s32.totalorder %s1594_s18, 1  ;;  %p1297_p3 = scmp.ge.s32.totalorder %s1554_s17, 1 }
   0x6   : > { %s1604_s22 = scalar_select %p113_p0, %s1550_s16, %s115_s21  }
   0x7   : > { %p1606_p4 = por %p126_p2, %p125_p1  ;;  %p174_p5 = scmp.lt.s32.totalorder %s1554_s17, 3 }
   0x9   : > { %p175_p6 = pnand %p1297_p3, %p174_p5 }
   0xa   : > { %s1299_s14 = sshll.u32 (!%p175_p6), %s1594_s18, 4  ;;  %s201_s29 = sand.u32 (!%p175_p6), 1, %s1546_s15  }
   0xb   : > { %178 = sbr.rel (%p175_p6) target bundleno = 1113 (0x459), region = 36  ;;  %p205_p7 = scmp.lt.s32.totalorder (!%p175_p6), %s1299_s14, 31 }
   0xc   : > { %s1298_s30 = sshll.u32 (!%p175_p6), %s201_s29, 8 }
   0xd   : > { %s2240_s8 = scalar_lea.vmem (!%p175_p6), [#allocation2], %s1298_s30 }
  0x10   : > { %v248_v0 = vld [vmem:[%s2485_s2 + $0x78] sm:$0xff]  ;;  %v247_v1 = vld [vmem:[%s2485_s2 + $0x70] sm:$0xff]  ;;  %v246_v2 = vld [vmem:[%s2485_s2 + $0x68] sm:$0xff]  ;;  %s2493_s14 = smov (!%p205_p7, %s1299_s14), 31  ;;  %s1420_s7 = sshll.u32 (%p1606_p4), %s1594_s18, 7 }
  0x11   : > { %251 = vmatpush.msra.mxu0 %v248_v0  ;;  %1421 = vmatpush.msra.mxu3 %v248_v0  ;;  %v245_v3 = vld [vmem:[%s2485_s2 + $0x60] sm:$0xff]  ;;  %v244_v4 = vld [vmem:[%s2485_s2 + $0x58] sm:$0xff]  ;;  %v243_v5 = vld [vmem:[%s2485_s2 + $0x50] sm:$0xff]  ;;  %s1300_s5 = sshll.u32 %s2493_s14, 3  ;;  %s2409_s14 = scalar_lea.vmem (%p1606_p4), %s2487_s4, %s1420_s7 }
  0x12   : > { %v242_v6 = vld [vmem:[%s2485_s2 + $0x48] sm:$0xff]  ;;  %v241_v7 = vld [vmem:[%s2485_s2 + $0x40] sm:$0xff]  ;;  %v240_v8 = vld [vmem:[%s2485_s2 + $0x38] sm:$0xff]  ;;  %s1664_s12 = scalar_lea.vmem %s2483_s0, %s1300_s5  ;;  %s2248_s10 = scalar_lea.vmem %s2484_s1, %s1300_s5 }
  0x13   : > { %252 = vmatpush.msra.mxu0 %v247_v1  ;;  %1422 = vmatpush.msra.mxu3 %v247_v1  ;;  %v239_v9 = vld [vmem:[%s2485_s2 + $0x30] sm:$0xff]  ;;  %v238_v10 = vld [vmem:[%s2485_s2 + $0x28] sm:$0xff]  ;;  %v237_v11 = vld [vmem:[%s2485_s2 + $0x20] sm:$0xff] }
  0x14   : > { %v236_v12 = vld [vmem:[%s2485_s2 + $0x18] sm:$0xff]  ;;  %v235_v13 = vld [vmem:[%s2485_s2 + $0x10] sm:$0xff]  ;;  %v234_v14 = vld [vmem:[%s2485_s2 + $0x8] sm:$0xff] }
  0x15   : > { %253 = vmatpush.msra.mxu0 %v246_v2  ;;  %1423 = vmatpush.msra.mxu3 %v246_v2  ;;  %v233_v15 = vld [vmem:[%s2485_s2] sm:$0xff]  ;;  %v218_v18 = vld [vmem:[%s1664_s12 + $0x8] sm:$0xff]  ;;  %v219_v20 = vld [vmem:[%s1664_s12 + $0x10] sm:$0xff] }
  0x16   : > { %v217_v16 = vld [vmem:[%s1664_s12] sm:$0xff]  ;;  %v222_v19 = vld [vmem:[%s1664_s12 + $0x28] sm:$0xff]  ;;  %v223_v21 = vld [vmem:[%s1664_s12 + $0x30] sm:$0xff] }
  0x17   : > { %254 = vmatpush.msra.mxu0 %v245_v3  ;;  %1424 = vmatpush.msra.mxu3 %v245_v3  ;;  %v221_v17 = vld [vmem:[%s1664_s12 + $0x20] sm:$0xff]  ;;  %v220_v22 = vld [vmem:[%s1664_s12 + $0x18] sm:$0xff]  ;;  %v226_v25 = vld [vmem:[%s1664_s12 + $0x48] sm:$0xff] }
  0x18   : > { %v224_v23 = vld [vmem:[%s1664_s12 + $0x38] sm:$0xff]  ;;  %v225_v24 = vld [vmem:[%s1664_s12 + $0x40] sm:$0xff]  ;;  %v227_v26 = vld [vmem:[%s1664_s12 + $0x50] sm:$0xff] }
  0x19   : > { %255 = vmatpush.msra.mxu0 %v244_v4  ;;  %1425 = vmatpush.msra.mxu3 %v244_v4  ;;  %v228_v27 = vld [vmem:[%s1664_s12 + $0x58] sm:$0xff]  ;;  %v1317_v29 = vld [vmem:[%s2485_s2 + $0xf0] sm:$0xff]  ;;  %v1316_v30 = vld [vmem:[%s2485_s2 + $0xe8] sm:$0xff] }
  0x1a   : > { %v1318_v28 = vld [vmem:[%s2485_s2 + $0xf8] sm:$0xff]  ;;  %v1315_v31 = vld [vmem:[%s2485_s2 + $0xe0] sm:$0xff]  ;;  %v1313_v34 = vld [vmem:[%s2485_s2 + $0xd0] sm:$0xff] }
  0x1b   : > { %256 = vmatpush.msra.mxu0 %v243_v5  ;;  %1426 = vmatpush.msra.mxu3 %v243_v5  ;;  %v229_v32 = vld [vmem:[%s1664_s12 + $0x60] sm:$0xff]  ;;  %v1314_v33 = vld [vmem:[%s2485_s2 + $0xd8] sm:$0xff]  ;;  %v1312_v35 = vld [vmem:[%s2485_s2 + $0xc8] sm:$0xff] }
  0x1c   : > { %1437 = vmatpush.msra.mxu1 %v1318_v28  ;;  %v1311_v36 = vld [vmem:[%s2485_s2 + $0xc0] sm:$0xff]  ;;  %v230_v37 = vld [vmem:[%s1664_s12 + $0x68] sm:$0xff]  ;;  %v1310_v38 = vld [vmem:[%s2485_s2 + $0xb8] sm:$0xff] }
  0x1d   : > { %257 = vmatpush.msra.mxu0 %v242_v6  ;;  %1427 = vmatpush.msra.mxu3 %v242_v6  ;;  %v1309_v39 = vld [vmem:[%s2485_s2 + $0xb0] sm:$0xff]  ;;  %v1308_v40 = vld [vmem:[%s2485_s2 + $0xa8] sm:$0xff]  ;;  %v1307_v41 = vld [vmem:[%s2485_s2 + $0xa0] sm:$0xff] }
  0x1e   : > { %1438 = vmatpush.msra.mxu1 %v1317_v29  ;;  %v231_v42 = vld [vmem:[%s1664_s12 + $0x70] sm:$0xff]  ;;  %v1306_v43 = vld [vmem:[%s2485_s2 + $0x98] sm:$0xff]  ;;  %v1304_v46 = vld [vmem:[%s2485_s2 + $0x88] sm:$0xff] }
  0x1f   : > { %258 = vmatpush.msra.mxu0 %v241_v7  ;;  %1428 = vmatpush.msra.mxu3 %v241_v7  ;;  %v1305_v44 = vld [vmem:[%s2485_s2 + $0x90] sm:$0xff]  ;;  %v232_v45 = vld [vmem:[%s1664_s12 + $0x78] sm:$0xff]  ;;  %v1303_v47 = vld [vmem:[%s2485_s2 + $0x80] sm:$0xff] }
  0x20   : > { %1439 = vmatpush.msra.mxu1 %v1316_v30  ;;  %v1736_v48 = vld [vmem:[%s2486_s3] ss:$0 sm:$0xff] }
  0x21   : > { %259 = vmatpush.msra.mxu0 %v240_v8  ;;  %1429 = vmatpush.msra.mxu3 %v240_v8 }
  0x22   : > { %1440 = vmatpush.msra.mxu1 %v1315_v31 }
  0x23   : > { %260 = vmatpush.msra.mxu0 %v239_v9  ;;  %1430 = vmatpush.msra.mxu3 %v239_v9 }
  0x24   : > { %1441 = vmatpush.msra.mxu1 %v1314_v33 }
  0x25   : > { %261 = vmatpush.msra.mxu0 %v238_v10  ;;  %1431 = vmatpush.msra.mxu3 %v238_v10 }
  0x26   : > { %1442 = vmatpush.msra.mxu1 %v1313_v34 }
  0x27   : > { %262 = vmatpush.msra.mxu0 %v237_v11  ;;  %1432 = vmatpush.msra.mxu3 %v237_v11 }
  0x28   : > { %1443 = vmatpush.msra.mxu1 %v1312_v35 }
  0x29   : > { %263 = vmatpush.msra.mxu0 %v236_v12  ;;  %1433 = vmatpush.msra.mxu3 %v236_v12 }
  0x2a   : > { %1444 = vmatpush.msra.mxu1 %v1311_v36 }
  0x2b   : > { %264 = vmatpush.msra.mxu0 %v235_v13  ;;  %1434 = vmatpush.msra.mxu3 %v235_v13 }
  0x2c   : > { %1445 = vmatpush.msra.mxu1 %v1310_v38 }
  0x2d   : > { %265 = vmatpush.msra.mxu0 %v234_v14  ;;  %1435 = vmatpush.msra.mxu3 %v234_v14 }
  0x2e   : > { %1446 = vmatpush.msra.mxu1 %v1309_v39 }
  0x2f   : > { %266 = vmatpush.msra.mxu0 %v233_v15  ;;  %1436 = vmatpush.msra.mxu3 %v233_v15 }
  0x30   : > { %267 = vmatmul.f32.vlgmr.msra.gmra.mxu0 %v217_v16  ;;  %279 = vmatmul.f32.vlgmr.msra.gmra.mxu3 %v221_v17 }
  0x31   : > { %351 = vmatpush.msrb.mxu0 %v1318_v28  ;;  %1447 = vmatpush.msra.mxu1 %v1308_v40  ;;  %v1330_v28 = vld [vmem:[%s2485_s2 + $0x158] sm:$0xff] }
  0x33   : > { %352 = vmatpush.msrb.mxu0 %v1317_v29  ;;  %1448 = vmatpush.msra.mxu1 %v1307_v41  ;;  %v1329_v29 = vld [vmem:[%s2485_s2 + $0x150] sm:$0xff] }
  0x35   : > { %353 = vmatpush.msrb.mxu0 %v1316_v30  ;;  %1449 = vmatpush.msra.mxu1 %v1306_v43  ;;  %v1328_v30 = vld [vmem:[%s2485_s2 + $0x148] sm:$0xff] }
  0x37   : > { %354 = vmatpush.msrb.mxu0 %v1315_v31  ;;  %1450 = vmatpush.msra.mxu1 %v1305_v44 }
  0x38   : > { %270 = vmatmul.f32.gmra.mxu0 %v218_v18  ;;  %282 = vmatmul.f32.gmra.mxu3 %v222_v19 }
  0x39   : > { %355 = vmatpush.msrb.mxu0 %v1314_v33  ;;  %1451 = vmatpush.msra.mxu1 %v1304_v46  ;;  %v1327_v33 = vld [vmem:[%s2485_s2 + $0x140] sm:$0xff] }
  0x3b   : > { %356 = vmatpush.msrb.mxu0 %v1313_v34  ;;  %1452 = vmatpush.msra.mxu1 %v1303_v47 }
  0x3d   : > { %357 = vmatpush.msrb.mxu0 %v1312_v35  ;;  %v1326_v35 = vld [vmem:[%s2485_s2 + $0x138] sm:$0xff] }
  0x3f   : > { %358 = vmatpush.msrb.mxu0 %v1311_v36  ;;  %v1325_v36 = vld [vmem:[%s2485_s2 + $0x130] sm:$0xff] }
  0x40   : > { %273 = vmatmul.f32.gmra.mxu0 %v219_v20  ;;  %285 = vmatmul.f32.gmra.mxu3 %v223_v21  ;;  %v1334_v21 = vld [vmem:[%s2485_s2 + $0x178] sm:$0xff] }
  0x41   : > { %359 = vmatpush.msrb.mxu0 %v1310_v38  ;;  %1453 = vmatpush.msra.mxu2 %v1334_v21 }
  0x43   : > { %360 = vmatpush.msrb.mxu0 %v1309_v39 }
  0x45   : > { %361 = vmatpush.msrb.mxu0 %v1308_v40  ;;  %v1323_v40 = vld [vmem:[%s2485_s2 + $0x120] sm:$0xff] }
  0x47   : > { %362 = vmatpush.msrb.mxu0 %v1307_v41 }
  0x48   : > { %276 = vmatmul.f32.gmra.mxu0 %v220_v22  ;;  %288 = vmatmul.f32.gmra.mxu3 %v224_v23  ;;  %v1333_v22 = vld [vmem:[%s2485_s2 + $0x170] sm:$0xff]  ;;  %v1332_v23 = vld [vmem:[%s2485_s2 + $0x168] sm:$0xff] }
  0x49   : > { %363 = vmatpush.msrb.mxu0 %v1306_v43  ;;  %1454 = vmatpush.msra.mxu2 %v1333_v22 }
  0x4b   : > { %364 = vmatpush.msrb.mxu0 %v1305_v44  ;;  %1455 = vmatpush.msra.mxu2 %v1332_v23 }
  0x4d   : > { %365 = vmatpush.msrb.mxu0 %v1304_v46  ;;  %v1321_v46 = vld [vmem:[%s2485_s2 + $0x110] sm:$0xff] }
  0x4f   : > { %366 = vmatpush.msrb.mxu0 %v1303_v47  ;;  %v1320_v47 = vld [vmem:[%s2485_s2 + $0x108] sm:$0xff] }
  0x50   : > { %291 = vmatmul.f32.gmra.mxu3 %v225_v24 }
  0x51   : > { %467 = vmatpush.msra.mxu0 %v1334_v21 }
  0x53   : > { %468 = vmatpush.msra.mxu0 %v1333_v22 }
  0x55   : > { %469 = vmatpush.msra.mxu0 %v1332_v23 }
  0x58   : > { %294 = vmatmul.f32.gmra.mxu3 %v226_v25 }
  0x60   : > { %297 = vmatmul.f32.gmra.mxu3 %v227_v26  ;;  %v1331_v26 = vld [vmem:[%s2485_s2 + $0x160] sm:$0xff] }
  0x61   : > { %470 = vmatpush.msra.mxu0 %v1331_v26  ;;  %1456 = vmatpush.msra.mxu2 %v1331_v26 }
  0x63   : > { %471 = vmatpush.msra.mxu0 %v1330_v28  ;;  %1457 = vmatpush.msra.mxu2 %v1330_v28  ;;  %v1349_v28 = vld [vmem:[%s2485_s2 + $0x1f0] sm:$0xff] }
  0x65   : > { %472 = vmatpush.msra.mxu0 %v1329_v29  ;;  %1458 = vmatpush.msra.mxu2 %v1329_v29 }
  0x67   : > { %473 = vmatpush.msra.mxu0 %v1328_v30  ;;  %1459 = vmatpush.msra.mxu2 %v1328_v30 }
  0x68   : > { %300 = vmatmul.f32.gmra.mxu3 %v228_v27 }
  0x69   : > { %474 = vmatpush.msra.mxu0 %v1327_v33  ;;  %1460 = vmatpush.msra.mxu2 %v1327_v33 }
  0x6b   : > { %475 = vmatpush.msra.mxu0 %v1326_v35  ;;  %1461 = vmatpush.msra.mxu2 %v1326_v35 }
  0x6d   : > { %476 = vmatpush.msra.mxu0 %v1325_v36  ;;  %1462 = vmatpush.msra.mxu2 %v1325_v36 }
  0x70   : > { %303 = vmatmul.f32.gmra.mxu3 %v229_v32 }
  0x78   : > { %306 = vmatmul.f32.gmra.mxu3 %v230_v37  ;;  %v1324_v37 = vld [vmem:[%s2485_s2 + $0x128] sm:$0xff] }
  0x79   : > { %477 = vmatpush.msra.mxu0 %v1324_v37  ;;  %1463 = vmatpush.msra.mxu2 %v1324_v37 }
  0x7b   : > { %478 = vmatpush.msra.mxu0 %v1323_v40  ;;  %1464 = vmatpush.msra.mxu2 %v1323_v40  ;;  %v1346_v40 = vld [vmem:[%s2485_s2 + $0x1d8] sm:$0xff] }
  0x80   : > { %309 = vmatmul.f32.gmra.mxu3 %v231_v42  ;;  %v1322_v42 = vld [vmem:[%s2485_s2 + $0x118] sm:$0xff] }
  0x81   : > { %479 = vmatpush.msra.mxu0 %v1322_v42  ;;  %1465 = vmatpush.msra.mxu2 %v1322_v42 }
  0x83   : > { %480 = vmatpush.msra.mxu0 %v1321_v46  ;;  %1466 = vmatpush.msra.mxu2 %v1321_v46  ;;  %v1344_v46 = vld [vmem:[%s2485_s2 + $0x1c8] sm:$0xff] }
  0x85   : > { %481 = vmatpush.msra.mxu0 %v1320_v47  ;;  %1467 = vmatpush.msra.mxu2 %v1320_v47 }
  0x88   : > { %312 = vmatmul.f32.gmra.mxu3 %v232_v45 }
  0xad   : > { %v268_v49 = vpop.f32.mrf.mxu0 }
  0xae   : > { %v1739_v50 = vadd.f32 %v1736_v48, %v268_v49  ;;  %v1885_v49 = vld [vmem:[%s2486_s3 + $0x1] ss:$0 sm:$0xff] }
  0xb0   : > { %v316_v51 = vmax.f32 %v1739_v50, 0.0 }
  0xb2   : > { %367 = vmatmul.f32.vlgmr.msrb.gmra.mxu0 %v316_v51 }
  0xb3   : > { %v280_v52 = vpop.f32.mrf.mxu3 }
  0xb4   : > { %v1745_v53 = vadd.f32 %v1736_v48, %v280_v52 }
  0xb5   : > { %v271_v54 = vpop.f32.mrf.mxu0 }
  0xb6   : > { %v1748_v55 = vadd.f32 %v1736_v48, %v271_v54  ;;  %v320_v56 = vmax.f32 %v1745_v53, 0.0 }
  0xb8   : > { %379 = vmatmul.f32.vlgmr.msra.gmra.mxu1 %v320_v56  ;;  %v317_v57 = vmax.f32 %v1748_v55, 0.0 }
  0xba   : > { %370 = vmatmul.f32.gmra.mxu0 %v317_v57 }
  0xbb   : > { %v283_v58 = vpop.f32.mrf.mxu3 }
  0xbc   : > { %v1757_v59 = vadd.f32 %v1736_v48, %v283_v58 }
  0xbd   : > { %v274_v60 = vpop.f32.mrf.mxu0 }
  0xbe   : > { %v1760_v61 = vadd.f32 %v1736_v48, %v274_v60  ;;  %v321_v62 = vmax.f32 %v1757_v59, 0.0  ;;  %v1347_v59 = vld [vmem:[%s2485_s2 + $0x1e0] sm:$0xff] }
  0xc0   : > { %382 = vmatmul.f32.gmra.mxu1 %v321_v62  ;;  %v318_v63 = vmax.f32 %v1760_v61, 0.0 }
  0xc2   : > { %373 = vmatmul.f32.gmra.mxu0 %v318_v63 }
  0xc3   : > { %v286_v0 = vpop.f32.mrf.mxu3 }
  0xc4   : > { %v1769_v1 = vadd.f32 %v1736_v48, %v286_v0 }
  0xc5   : > { %v277_v2 = vpop.f32.mrf.mxu0 }
  0xc6   : > { %v1772_v3 = vadd.f32 %v1736_v48, %v277_v2  ;;  %v322_v4 = vmax.f32 %v1769_v1, 0.0 }
  0xc8   : > { %385 = vmatmul.f32.gmra.mxu1 %v322_v4  ;;  %v319_v5 = vmax.f32 %v1772_v3, 0.0  ;;  %v1345_v3 = vld [vmem:[%s2485_s2 + $0x1d0] sm:$0xff] }
  0xca   : > { %376 = vmatmul.f32.gmra.mxu0 %v319_v5 }
  0xcb   : > { %v289_v6 = vpop.f32.mrf.mxu3 }
  0xcc   : > { %v1781_v7 = vadd.f32 %v1736_v48, %v289_v6 }
  0xce   : > { %v323_v8 = vmax.f32 %v1781_v7, 0.0 }
  0xd0   : > { %388 = vmatmul.f32.gmra.mxu1 %v323_v8 }
  0xd3   : > { %v292_v9 = vpop.f32.mrf.mxu3 }
  0xd4   : > { %v1787_v10 = vadd.f32 %v1736_v48, %v292_v9 }
  0xd6   : > { %v324_v11 = vmax.f32 %v1787_v10, 0.0 }
  0xd8   : > { %391 = vmatmul.f32.gmra.mxu1 %v324_v11 }
  0xdb   : > { %v295_v12 = vpop.f32.mrf.mxu3 }
  0xdc   : > { %v1793_v13 = vadd.f32 %v1736_v48, %v295_v12 }
  0xde   : > { %v325_v14 = vmax.f32 %v1793_v13, 0.0  ;;  %v1341_v13 = vld [vmem:[%s2485_s2 + $0x1b0] sm:$0xff] }
  0xe0   : > { %394 = vmatmul.f32.gmra.mxu1 %v325_v14 }
  0xe3   : > { %v298_v15 = vpop.f32.mrf.mxu3 }
  0xe4   : > { %v1799_v16 = vadd.f32 %v1736_v48, %v298_v15  ;;  %v1350_v15 = vld [vmem:[%s2485_s2 + $0x1f8] sm:$0xff] }
  0xe5   : > { %567 = vmatpush.msrb.mxu3 %v1350_v15  ;;  %v1338_v15 = vld [vmem:[%s2485_s2 + $0x198] sm:$0xff] }
  0xe6   : > { %v326_v17 = vmax.f32 %v1799_v16, 0.0  ;;  %v1339_v16 = vld [vmem:[%s2485_s2 + $0x1a0] sm:$0xff] }
  0xe7   : > { %568 = vmatpush.msrb.mxu3 %v1349_v28 }
  0xe8   : > { %397 = vmatmul.f32.gmra.mxu1 %v326_v17 }
  0xeb   : > { %v301_v18 = vpop.f32.mrf.mxu3 }
  0xec   : > { %v1805_v19 = vadd.f32 %v1736_v48, %v301_v18 }
  0xee   : > { %v327_v20 = vmax.f32 %v1805_v19, 0.0 }
  0xf0   : > { %400 = vmatmul.f32.gmra.mxu1 %v327_v20 }
  0xf3   : > { %v304_v24 = vpop.f32.mrf.mxu3 }
  0xf4   : > { %v1820_v25 = vadd.f32 %v1736_v48, %v304_v24 }
  0xf6   : > { %v328_v27 = vmax.f32 %v1820_v25, 0.0 }
  0xf8   : > { %403 = vmatmul.f32.gmra.mxu1 %v328_v27 }
  0xfb   : > { %v307_v31 = vpop.f32.mrf.mxu3 }
  0xfc   : > { %v1838_v32 = vadd.f32 %v1736_v48, %v307_v31 }
  0xfe   : > { %v329_v34 = vmax.f32 %v1838_v32, 0.0  ;;  %v1986_v32 = vld [vmem:[%s2486_s3 + $0x2] ss:$0 sm:$0xff] }
 0x100   : > { %406 = vmatmul.f32.gmra.mxu1 %v329_v34 }
 0x103   : > { %v310_v38 = vpop.f32.mrf.mxu3 }
 0x104   : > { %v1856_v39 = vadd.f32 %v1736_v48, %v310_v38 }
 0x106   : > { %v330_v41 = vmax.f32 %v1856_v39, 0.0 }
 0x108   : > { %409 = vmatmul.f32.gmra.mxu1 %v330_v41 }
 0x10b   : > { %v313_v43 = vpop.f32.mrf.mxu3 }
 0x10c   : > { %v1868_v44 = vadd.f32 %v1736_v48, %v313_v43  ;;  %v1319_v48 = vld [vmem:[%s2485_s2 + $0x100] sm:$0xff] }
 0x10d   : > { %482 = vmatpush.msra.mxu0 %v1319_v48  ;;  %1468 = vmatpush.msra.mxu2 %v1319_v48  ;;  %v1343_v48 = vld [vmem:[%s2485_s2 + $0x1c0] sm:$0xff] }
 0x10e   : > { %v331_v45 = vmax.f32 %v1868_v44, 0.0 }
 0x110   : > { %412 = vmatmul.f32.gmra.mxu1 %v331_v45 }
 0x12f   : > { %v368_v52 = vpop.f32.mrf.mxu0 }
 0x130   : > { %v369_v54 = vadd.f32 %v1885_v49, %v368_v52 }
 0x132   : > { %v416_v58 = vmax.f32 %v369_v54, 0.0 }
 0x134   : > { %v432_v60 = vadd.f32 %v416_v58, %v316_v51  ;;  %v1342_v58 = vld [vmem:[%s2485_s2 + $0x1b8] sm:$0xff] }
 0x135   : > { %v380_v0 = vpop.f32.mrf.mxu1 }
 0x136   : > { %v381_v2 = vadd.f32 %v1885_v49, %v380_v0  ;;  %483 = vmatmul.f32.vlgmr.msra.gmra.mxu0 %v432_v60 }
 0x137   : > { %v371_v6 = vpop.f32.mrf.mxu0 }
 0x138   : > { %v420_v9 = vmax.f32 %v381_v2, 0.0  ;;  %v372_v12 = vadd.f32 %v1885_v49, %v371_v6 }
 0x13a   : > { %v417_v18 = vmax.f32 %v372_v12, 0.0  ;;  %v436_v21 = vadd.f32 %v420_v9, %v320_v56  ;;  %v1348_v56 = vld [vmem:[%s2485_s2 + $0x1e8] sm:$0xff] }
 0x13b   : > { %569 = vmatpush.msrb.mxu3 %v1348_v56  ;;  %v1340_v9 = vld [vmem:[%s2485_s2 + $0x1a8] sm:$0xff] }
 0x13c   : > { %495 = vmatmul.f32.vlgmr.msra.gmra.mxu2 %v436_v21  ;;  %v433_v50 = vadd.f32 %v417_v18, %v317_v57  ;;  %v1336_v21 = vld [vmem:[%s2485_s2 + $0x188] sm:$0xff] }
 0x13d   : > { %v383_v51 = vpop.f32.mrf.mxu1  ;;  %570 = vmatpush.msrb.mxu3 %v1347_v59 }
 0x13e   : > { %v384_v22 = vadd.f32 %v1885_v49, %v383_v51  ;;  %486 = vmatmul.f32.gmra.mxu0 %v433_v50  ;;  %v1335_v50 = vld [vmem:[%s2485_s2 + $0x180] sm:$0xff] }
 0x13f   : > { %v374_v23 = vpop.f32.mrf.mxu0  ;;  %571 = vmatpush.msrb.mxu3 %v1346_v40 }
 0x140   : > { %v421_v24 = vmax.f32 %v384_v22, 0.0  ;;  %v375_v26 = vadd.f32 %v1885_v49, %v374_v23 }
 0x141   : > { %572 = vmatpush.msrb.mxu3 %v1345_v3 }
 0x142   : > { %v418_v29 = vmax.f32 %v375_v26, 0.0  ;;  %v437_v53 = vadd.f32 %v421_v24, %v321_v62 }
 0x143   : > { %573 = vmatpush.msrb.mxu3 %v1344_v46 }
 0x144   : > { %498 = vmatmul.f32.gmra.mxu2 %v437_v53  ;;  %v434_v55 = vadd.f32 %v418_v29, %v318_v63 }
 0x145   : > { %v386_v57 = vpop.f32.mrf.mxu1  ;;  %574 = vmatpush.msrb.mxu3 %v1343_v48 }
 0x146   : > { %v387_v30 = vadd.f32 %v1885_v49, %v386_v57  ;;  %489 = vmatmul.f32.gmra.mxu0 %v434_v55 }
 0x147   : > { %v377_v31 = vpop.f32.mrf.mxu0  ;;  %575 = vmatpush.msrb.mxu3 %v1342_v58 }
 0x148   : > { %v422_v33 = vmax.f32 %v387_v30, 0.0  ;;  %v378_v35 = vadd.f32 %v1885_v49, %v377_v31 }
 0x149   : > { %576 = vmatpush.msrb.mxu3 %v1341_v13 }
 0x14a   : > { %v419_v61 = vmax.f32 %v378_v35, 0.0  ;;  %v438_v62 = vadd.f32 %v422_v33, %v322_v4 }
 0x14b   : > { %577 = vmatpush.msrb.mxu3 %v1340_v9  ;;  %v1361_v9 = vld [vmem:[%s2485_s2 + $0x250] sm:$0xff] }
 0x14c   : > { %501 = vmatmul.f32.gmra.mxu2 %v438_v62  ;;  %v435_v63 = vadd.f32 %v419_v61, %v319_v5 }
 0x14d   : > { %v389_v36 = vpop.f32.mrf.mxu1  ;;  %578 = vmatpush.msrb.mxu3 %v1339_v16  ;;  %v1360_v16 = vld [vmem:[%s2485_s2 + $0x248] sm:$0xff] }
 0x14e   : > { %v390_v37 = vadd.f32 %v1885_v49, %v389_v36  ;;  %492 = vmatmul.f32.gmra.mxu0 %v435_v63 }
 0x14f   : > { %579 = vmatpush.msrb.mxu3 %v1338_v15  ;;  %v1358_v15 = vld [vmem:[%s2485_s2 + $0x238] sm:$0xff] }
 0x150   : > { %v423_v38 = vmax.f32 %v390_v37, 0.0 }
 0x152   : > { %v439_v42 = vadd.f32 %v423_v38, %v323_v8 }
 0x154   : > { %504 = vmatmul.f32.gmra.mxu2 %v439_v42 }
 0x155   : > { %v392_v1 = vpop.f32.mrf.mxu1 }
 0x156   : > { %v393_v4 = vadd.f32 %v1885_v49, %v392_v1 }
 0x158   : > { %v424_v43 = vmax.f32 %v393_v4, 0.0 }
 0x15a   : > { %v440_v5 = vadd.f32 %v424_v43, %v324_v11 }
 0x15c   : > { %507 = vmatmul.f32.gmra.mxu2 %v440_v5 }
 0x15d   : > { %v395_v7 = vpop.f32.mrf.mxu1 }
 0x15e   : > { %v396_v8 = vadd.f32 %v1885_v49, %v395_v7 }
 0x160   : > { %v425_v47 = vmax.f32 %v396_v8, 0.0 }
 0x162   : > { %v441_v52 = vadd.f32 %v425_v47, %v325_v14 }
 0x164   : > { %510 = vmatmul.f32.gmra.mxu2 %v441_v52 }
 0x165   : > { %v398_v10 = vpop.f32.mrf.mxu1 }
 0x166   : > { %v399_v11 = vadd.f32 %v1885_v49, %v398_v10 }
 0x168   : > { %v426_v54 = vmax.f32 %v399_v11, 0.0  ;;  %v1366_v11 = vld [vmem:[%s2485_s2 + $0x278] sm:$0xff] }
 0x169   : > { %683 = vmatpush.msrb.mxu0 %v1366_v11  ;;  %v1382_v11 = vld [vmem:[%s2485_s2 + $0x2f8] sm:$0xff] }
 0x16a   : > { %v442_v60 = vadd.f32 %v426_v54, %v326_v17  ;;  %v1365_v54 = vld [vmem:[%s2485_s2 + $0x270] sm:$0xff]  ;;  %866 = vmatpush.msrb.mxu1 %v1382_v11 }
 0x16b   : > { %684 = vmatpush.msrb.mxu0 %v1365_v54 }
 0x16c   : > { %513 = vmatmul.f32.gmra.mxu2 %v442_v60  ;;  %v1364_v60 = vld [vmem:[%s2485_s2 + $0x268] sm:$0xff] }
 0x16d   : > { %v401_v0 = vpop.f32.mrf.mxu1  ;;  %685 = vmatpush.msrb.mxu0 %v1364_v60 }
 0x16e   : > { %v402_v2 = vadd.f32 %v1885_v49, %v401_v0 }
 0x170   : > { %v427_v6 = vmax.f32 %v402_v2, 0.0  ;;  %v1363_v2 = vld [vmem:[%s2485_s2 + $0x260] sm:$0xff] }
 0x171   : > { %686 = vmatpush.msrb.mxu0 %v1363_v2 }
 0x172   : > { %v443_v14 = vadd.f32 %v427_v6, %v327_v20  ;;  %v1337_v20 = vld [vmem:[%s2485_s2 + $0x190] sm:$0xff]  ;;  %v1362_v6 = vld [vmem:[%s2485_s2 + $0x258] sm:$0xff] }
 0x173   : > { %580 = vmatpush.msrb.mxu3 %v1337_v20  ;;  %687 = vmatpush.msrb.mxu0 %v1362_v6  ;;  %v1357_v20 = vld [vmem:[%s2485_s2 + $0x230] sm:$0xff] }
 0x174   : > { %516 = vmatmul.f32.gmra.mxu2 %v443_v14 }
 0x175   : > { %v404_v17 = vpop.f32.mrf.mxu1  ;;  %581 = vmatpush.msrb.mxu3 %v1336_v21  ;;  %688 = vmatpush.msrb.mxu0 %v1361_v9  ;;  %v1356_v21 = vld [vmem:[%s2485_s2 + $0x228] sm:$0xff]  ;;  %v1379_v9 = vld [vmem:[%s2485_s2 + $0x2e0] sm:$0xff] }
 0x176   : > { %v405_v12 = vadd.f32 %v1885_v49, %v404_v17 }
 0x177   : > { %582 = vmatpush.msrb.mxu3 %v1335_v50  ;;  %689 = vmatpush.msrb.mxu0 %v1360_v16 }
 0x178   : > { %v428_v19 = vmax.f32 %v405_v12, 0.0  ;;  %v1359_v12 = vld [vmem:[%s2485_s2 + $0x240] sm:$0xff] }
 0x179   : > { %690 = vmatpush.msrb.mxu0 %v1359_v12  ;;  %v1378_v12 = vld [vmem:[%s2485_s2 + $0x2d8] sm:$0xff] }
 0x17a   : > { %v444_v18 = vadd.f32 %v428_v19, %v328_v27 }
 0x17b   : > { %691 = vmatpush.msrb.mxu0 %v1358_v15 }
 0x17c   : > { %519 = vmatmul.f32.gmra.mxu2 %v444_v18 }
 0x17d   : > { %v407_v51 = vpop.f32.mrf.mxu1  ;;  %692 = vmatpush.msrb.mxu0 %v1357_v20 }
 0x17e   : > { %v408_v22 = vadd.f32 %v1885_v49, %v407_v51  ;;  %v1355_v51 = vld [vmem:[%s2485_s2 + $0x220] sm:$0xff] }
 0x17f   : > { %693 = vmatpush.msrb.mxu0 %v1356_v21 }
 0x180   : > { %v429_v23 = vmax.f32 %v408_v22, 0.0  ;;  %v1354_v22 = vld [vmem:[%s2485_s2 + $0x218] sm:$0xff] }
 0x181   : > { %694 = vmatpush.msrb.mxu0 %v1355_v51 }
 0x182   : > { %v445_v25 = vadd.f32 %v429_v23, %v329_v34 }
 0x183   : > { %695 = vmatpush.msrb.mxu0 %v1354_v22 }
 0x184   : > { %522 = vmatmul.f32.gmra.mxu2 %v445_v25  ;;  %v1353_v25 = vld [vmem:[%s2485_s2 + $0x210] sm:$0xff] }
 0x185   : > { %v410_v27 = vpop.f32.mrf.mxu1  ;;  %696 = vmatpush.msrb.mxu0 %v1353_v25 }
 0x186   : > { %v411_v24 = vadd.f32 %v1885_v49, %v410_v27 }
 0x188   : > { %v430_v26 = vmax.f32 %v411_v24, 0.0 }
 0x18a   : > { %v446_v28 = vadd.f32 %v430_v26, %v330_v41  ;;  %v1352_v26 = vld [vmem:[%s2485_s2 + $0x208] sm:$0xff] }
 0x18b   : > { %697 = vmatpush.msrb.mxu0 %v1352_v26 }
 0x18c   : > { %525 = vmatmul.f32.gmra.mxu2 %v446_v28  ;;  %v1351_v28 = vld [vmem:[%s2485_s2 + $0x200] sm:$0xff] }
 0x18d   : > { %v413_v29 = vpop.f32.mrf.mxu1  ;;  %698 = vmatpush.msrb.mxu0 %v1351_v28 }
 0x18e   : > { %v414_v53 = vadd.f32 %v1885_v49, %v413_v29 }
 0x190   : > { %v431_v55 = vmax.f32 %v414_v53, 0.0 }
 0x192   : > { %v447_v56 = vadd.f32 %v431_v55, %v331_v45 }
 0x194   : > { %528 = vmatmul.f32.gmra.mxu2 %v447_v56 }
 0x1b3   : > { %v484_v34 = vpop.f32.mrf.mxu0 }
 0x1b4   : > { %v1989_v57 = vadd.f32 %v1986_v32, %v484_v34 }
 0x1b6   : > { %v532_v39 = vmax.f32 %v1989_v57, 0.0 }
 0x1b8   : > { %583 = vmatmul.f32.vlgmr.msrb.gmra.mxu3 %v532_v39 }
 0x1bb   : > { %v487_v41 = vpop.f32.mrf.mxu0 }
 0x1bc   : > { %v1995_v49 = vadd.f32 %v1986_v32, %v487_v41  ;;  %v2135_v41 = vld [vmem:[%s2486_s3 + $0x3] ss:$0 sm:$0xff] }
 0x1be   : > { %v533_v44 = vmax.f32 %v1995_v49, 0.0  ;;  %v1381_v49 = vld [vmem:[%s2485_s2 + $0x2f0] sm:$0xff] }
 0x1bf   : > { %v496_v45 = vpop.f32.mrf.mxu2  ;;  %867 = vmatpush.msrb.mxu1 %v1381_v49 }
 0x1c0   : > { %586 = vmatmul.f32.gmra.mxu3 %v533_v44  ;;  %v2013_v36 = vadd.f32 %v1986_v32, %v496_v45 }
 0x1c2   : > { %v536_v37 = vmax.f32 %v2013_v36, 0.0 }
 0x1c3   : > { %v490_v30 = vpop.f32.mrf.mxu0 }
 0x1c4   : > { %v2001_v31 = vadd.f32 %v1986_v32, %v490_v30 }
 0x1c6   : > { %v534_v33 = vmax.f32 %v2001_v31, 0.0  ;;  %v1380_v31 = vld [vmem:[%s2485_s2 + $0x2e8] sm:$0xff] }
 0x1c7   : > { %v499_v35 = vpop.f32.mrf.mxu2  ;;  %868 = vmatpush.msrb.mxu1 %v1380_v31  ;;  %v2237_v31 = vld [vmem:[%s2486_s3 + $0x4] ss:$0 sm:$0xff] }
 0x1c8   : > { %589 = vmatmul.f32.gmra.mxu3 %v534_v33  ;;  %v2019_v40 = vadd.f32 %v1986_v32, %v499_v35 }
 0x1c9   : > { %869 = vmatpush.msrb.mxu1 %v1379_v9 }
 0x1ca   : > { %v537_v42 = vmax.f32 %v2019_v40, 0.0  ;;  %v1376_v40 = vld [vmem:[%s2485_s2 + $0x2c8] sm:$0xff] }
 0x1cb   : > { %v493_v59 = vpop.f32.mrf.mxu0  ;;  %870 = vmatpush.msrb.mxu1 %v1378_v12 }
 0x1cc   : > { %v2007_v61 = vadd.f32 %v1986_v32, %v493_v59 }
 0x1ce   : > { %v535_v62 = vmax.f32 %v2007_v61, 0.0 }
 0x1cf   : > { %v502_v63 = vpop.f32.mrf.mxu2 }
 0x1d0   : > { %592 = vmatmul.f32.gmra.mxu3 %v535_v62  ;;  %v2025_v4 = vadd.f32 %v1986_v32, %v502_v63 }
 0x1d2   : > { %v538_v43 = vmax.f32 %v2025_v4, 0.0 }
 0x1d7   : > { %v505_v38 = vpop.f32.mrf.mxu2 }
 0x1d8   : > { %595 = vmatmul.f32.gmra.mxu3 %v536_v37  ;;  %v2031_v3 = vadd.f32 %v1986_v32, %v505_v38 }
 0x1da   : > { %v539_v46 = vmax.f32 %v2031_v3, 0.0 }
 0x1df   : > { %v508_v1 = vpop.f32.mrf.mxu2 }
 0x1e0   : > { %598 = vmatmul.f32.gmra.mxu3 %v537_v42  ;;  %v2037_v7 = vadd.f32 %v1986_v32, %v508_v1 }
 0x1e2   : > { %v540_v47 = vmax.f32 %v2037_v7, 0.0 }
 0x1e7   : > { %v511_v5 = vpop.f32.mrf.mxu2 }
 0x1e8   : > { %601 = vmatmul.f32.gmra.mxu3 %v538_v43  ;;  %v2043_v48 = vadd.f32 %v1986_v32, %v511_v5 }
 0x1ea   : > { %v541_v52 = vmax.f32 %v2043_v48, 0.0  ;;  %v1371_v48 = vld [vmem:[%s2485_s2 + $0x2a0] sm:$0xff] }
 0x1ef   : > { %v514_v8 = vpop.f32.mrf.mxu2 }
 0x1f0   : > { %604 = vmatmul.f32.gmra.mxu3 %v539_v46  ;;  %v2055_v58 = vadd.f32 %v1986_v32, %v514_v8 }
 0x1f2   : > { %v542_v0 = vmax.f32 %v2055_v58, 0.0  ;;  %v1370_v58 = vld [vmem:[%s2485_s2 + $0x298] sm:$0xff] }
 0x1f7   : > { %v517_v10 = vpop.f32.mrf.mxu2 }
 0x1f8   : > { %607 = vmatmul.f32.gmra.mxu3 %v540_v47  ;;  %v2070_v14 = vadd.f32 %v1986_v32, %v517_v10 }
 0x1fa   : > { %v543_v17 = vmax.f32 %v2070_v14, 0.0 }
 0x1ff   : > { %v520_v13 = vpop.f32.mrf.mxu2 }
 0x200   : > { %610 = vmatmul.f32.gmra.mxu3 %v541_v52  ;;  %v2088_v19 = vadd.f32 %v1986_v32, %v520_v13 }
 0x202   : > { %v544_v50 = vmax.f32 %v2088_v19, 0.0 }
 0x207   : > { %v523_v18 = vpop.f32.mrf.mxu2 }
 0x208   : > { %613 = vmatmul.f32.gmra.mxu3 %v542_v0  ;;  %v2106_v23 = vadd.f32 %v1986_v32, %v523_v18  ;;  %v1377_v18 = vld [vmem:[%s2485_s2 + $0x2d0] sm:$0xff] }
 0x209   : > { %871 = vmatpush.msrb.mxu1 %v1377_v18 }
 0x20a   : > { %v545_v24 = vmax.f32 %v2106_v23, 0.0 }
 0x20b   : > { %872 = vmatpush.msrb.mxu1 %v1376_v40 }
 0x20f   : > { %v526_v27 = vpop.f32.mrf.mxu2 }
 0x210   : > { %616 = vmatmul.f32.gmra.mxu3 %v543_v17  ;;  %v2121_v29 = vadd.f32 %v1986_v32, %v526_v27  ;;  %v1375_v27 = vld [vmem:[%s2485_s2 + $0x2c0] sm:$0xff] }
 0x211   : > { %873 = vmatpush.msrb.mxu1 %v1375_v27 }
 0x212   : > { %v546_v53 = vmax.f32 %v2121_v29, 0.0 }
 0x217   : > { %v529_v55 = vpop.f32.mrf.mxu2 }
 0x218   : > { %619 = vmatmul.f32.gmra.mxu3 %v544_v50  ;;  %v2127_v56 = vadd.f32 %v1986_v32, %v529_v55  ;;  %v1374_v55 = vld [vmem:[%s2485_s2 + $0x2b8] sm:$0xff] }
 0x219   : > { %874 = vmatpush.msrb.mxu1 %v1374_v55 }
 0x21a   : > { %v547_v34 = vmax.f32 %v2127_v56, 0.0  ;;  %v748_v56 = vlaneseq }
 0x220   : > { %622 = vmatmul.f32.gmra.mxu3 %v545_v24 }
 0x228   : > { %625 = vmatmul.f32.gmra.mxu3 %v546_v53 }
 0x230   : > { %628 = vmatmul.f32.gmra.mxu3 %v547_v34 }
 0x23b   : > { %v584_v45 = vpop.f32.mrf.mxu3 }
 0x23c   : > { %v585_v30 = vadd.f32 %v2135_v41, %v584_v45 }
 0x23e   : > { %v632_v35 = vmax.f32 %v585_v30, 0.0 }
 0x240   : > { %v648_v59 = vadd.f32 %v632_v35, %v532_v39  ;;  %v1373_v35 = vld [vmem:[%s2485_s2 + $0x2b0] sm:$0xff] }
 0x241   : > { %875 = vmatpush.msrb.mxu1 %v1373_v35 }
 0x242   : > { %699 = vmatmul.f32.vlgmr.msrb.gmra.mxu0 %v648_v59 }
 0x243   : > { %v587_v32 = vpop.f32.mrf.mxu3 }
 0x244   : > { %v588_v63 = vadd.f32 %v2135_v41, %v587_v32 }
 0x246   : > { %v633_v38 = vmax.f32 %v588_v63, 0.0  ;;  %v1372_v63 = vld [vmem:[%s2485_s2 + $0x2a8] sm:$0xff] }
 0x247   : > { %876 = vmatpush.msrb.mxu1 %v1372_v63 }
 0x248   : > { %v649_v1 = vadd.f32 %v633_v38, %v533_v44 }
 0x249   : > { %877 = vmatpush.msrb.mxu1 %v1371_v48 }
 0x24a   : > { %702 = vmatmul.f32.gmra.mxu0 %v649_v1 }
 0x24b   : > { %v590_v5 = vpop.f32.mrf.mxu3  ;;  %878 = vmatpush.msrb.mxu1 %v1370_v58 }
 0x24c   : > { %v591_v8 = vadd.f32 %v2135_v41, %v590_v5 }
 0x24e   : > { %v634_v10 = vmax.f32 %v591_v8, 0.0 }
 0x250   : > { %v650_v57 = vadd.f32 %v634_v10, %v534_v33 }
 0x252   : > { %705 = vmatmul.f32.gmra.mxu0 %v650_v57 }
 0x253   : > { %v593_v39 = vpop.f32.mrf.mxu3 }
 0x254   : > { %v594_v54 = vadd.f32 %v2135_v41, %v593_v39 }
 0x256   : > { %v635_v60 = vmax.f32 %v594_v54, 0.0  ;;  %v1368_v54 = vld [vmem:[%s2485_s2 + $0x288] sm:$0xff] }
 0x258   : > { %v651_v44 = vadd.f32 %v635_v60, %v535_v62 }
 0x25a   : > { %708 = vmatmul.f32.gmra.mxu0 %v651_v44 }
 0x25b   : > { %v596_v2 = vpop.f32.mrf.mxu3 }
 0x25c   : > { %v597_v6 = vadd.f32 %v2135_v41, %v596_v2 }
 0x25e   : > { %v636_v13 = vmax.f32 %v597_v6, 0.0 }
 0x260   : > { %v652_v33 = vadd.f32 %v636_v13, %v536_v37 }
 0x262   : > { %711 = vmatmul.f32.gmra.mxu0 %v652_v33 }
 0x263   : > { %v599_v61 = vpop.f32.mrf.mxu3 }
 0x264   : > { %v600_v62 = vadd.f32 %v2135_v41, %v599_v61  ;;  %v2251_v61 = vand.u32 127, %v748_v56 }
 0x266   : > { %v637_v16 = vmax.f32 %v600_v62, 0.0  ;;  %vm750_vm0 = vcmp.lt.s32.totalorder %v2251_v61, 16 }
 0x268   : > { %v653_v15 = vadd.f32 %v637_v16, %v537_v42  ;;  %v799_v16 = vld [vmem:[%s2248_s10] sm:$0xff] }
 0x26a   : > { %714 = vmatmul.f32.gmra.mxu0 %v653_v15 }
 0x26b   : > { %v602_v36 = vpop.f32.mrf.mxu3 }
 0x26c   : > { %v603_v37 = vadd.f32 %v2135_v41, %v602_v36 }
 0x26e   : > { %v638_v20 = vmax.f32 %v603_v37, 0.0 }
 0x270   : > { %v654_v21 = vadd.f32 %v638_v20, %v538_v43 }
 0x272   : > { %717 = vmatmul.f32.gmra.mxu0 %v654_v21 }
 0x273   : > { %v605_v51 = vpop.f32.mrf.mxu3 }
 0x274   : > { %v606_v22 = vadd.f32 %v2135_v41, %v605_v51  ;;  %v800_v51 = vld [vmem:[%s2248_s10 + $0x8] sm:$0xff] }
 0x276   : > { %v639_v25 = vmax.f32 %v606_v22, 0.0 }
 0x278   : > { %v655_v42 = vadd.f32 %v639_v25, %v539_v46 }
 0x27a   : > { %720 = vmatmul.f32.gmra.mxu0 %v655_v42  ;;  %v1398_v42 = vld [vmem:[%s2485_s2 + $0x378] sm:$0xff] }
 0x27b   : > { %v608_v4 = vpop.f32.mrf.mxu3  ;;  %966 = vmatpush.msrb.mxu2 %v1398_v42 }
 0x27c   : > { %v609_v43 = vadd.f32 %v2135_v41, %v608_v4 }
 0x27e   : > { %v640_v26 = vmax.f32 %v609_v43, 0.0 }
 0x280   : > { %v656_v28 = vadd.f32 %v640_v26, %v540_v47 }
 0x282   : > { %723 = vmatmul.f32.gmra.mxu0 %v656_v28  ;;  %v801_v28 = vld [vmem:[%s2248_s10 + $0x10] sm:$0xff] }
 0x283   : > { %v611_v3 = vpop.f32.mrf.mxu3 }
 0x284   : > { %v612_v46 = vadd.f32 %v2135_v41, %v611_v3 }
 0x286   : > { %v641_v45 = vmax.f32 %v612_v46, 0.0 }
 0x288   : > { %v657_v30 = vadd.f32 %v641_v45, %v541_v52  ;;  %v1397_v45 = vld [vmem:[%s2485_s2 + $0x370] sm:$0xff] }
 0x289   : > { %967 = vmatpush.msrb.mxu2 %v1397_v45  ;;  %v808_v45 = vld [vmem:[%s2248_s10 + $0x48] sm:$0xff] }
 0x28a   : > { %726 = vmatmul.f32.gmra.mxu0 %v657_v30  ;;  %v1396_v30 = vld [vmem:[%s2485_s2 + $0x368] sm:$0xff] }
 0x28b   : > { %v614_v7 = vpop.f32.mrf.mxu3  ;;  %968 = vmatpush.msrb.mxu2 %v1396_v30 }
 0x28c   : > { %v615_v47 = vadd.f32 %v2135_v41, %v614_v7 }
 0x28e   : > { %v642_v59 = vmax.f32 %v615_v47, 0.0 }
 0x290   : > { %v658_v32 = vadd.f32 %v642_v59, %v542_v0  ;;  %v1369_v0 = vld [vmem:[%s2485_s2 + $0x290] sm:$0xff] }
 0x291   : > { %879 = vmatpush.msrb.mxu1 %v1369_v0 }
 0x292   : > { %729 = vmatmul.f32.gmra.mxu0 %v658_v32  ;;  %v802_v32 = vld [vmem:[%s2248_s10 + $0x18] sm:$0xff] }
 0x293   : > { %v617_v52 = vpop.f32.mrf.mxu3  ;;  %880 = vmatpush.msrb.mxu1 %v1368_v54 }
 0x294   : > { %v618_v38 = vadd.f32 %v2135_v41, %v617_v52 }
 0x296   : > { %v643_v1 = vmax.f32 %v618_v38, 0.0  ;;  %v1395_v38 = vld [vmem:[%s2485_s2 + $0x360] sm:$0xff] }
 0x297   : > { %969 = vmatpush.msrb.mxu2 %v1395_v38 }
 0x298   : > { %v659_v5 = vadd.f32 %v643_v1, %v543_v17 }
 0x29a   : > { %732 = vmatmul.f32.gmra.mxu0 %v659_v5 }
 0x29b   : > { %v620_v8 = vpop.f32.mrf.mxu3 }
 0x29c   : > { %v621_v10 = vadd.f32 %v2135_v41, %v620_v8  ;;  %v803_v8 = vld [vmem:[%s2248_s10 + $0x20] sm:$0xff] }
 0x29e   : > { %v644_v11 = vmax.f32 %v621_v10, 0.0 }
 0x2a0   : > { %v660_v57 = vadd.f32 %v644_v11, %v544_v50  ;;  %v1367_v50 = vld [vmem:[%s2485_s2 + $0x280] sm:$0xff] }
 0x2a1   : > { %881 = vmatpush.msrb.mxu1 %v1367_v50 }
 0x2a2   : > { %735 = vmatmul.f32.gmra.mxu0 %v660_v57 }
 0x2a3   : > { %v623_v14 = vpop.f32.mrf.mxu3 }
 0x2a4   : > { %v624_v17 = vadd.f32 %v2135_v41, %v623_v14  ;;  %v1394_v14 = vld [vmem:[%s2485_s2 + $0x358] sm:$0xff] }
 0x2a5   : > { %970 = vmatpush.msrb.mxu2 %v1394_v14 }
 0x2a6   : > { %v645_v39 = vmax.f32 %v624_v17, 0.0 }
 0x2a8   : > { %v661_v60 = vadd.f32 %v645_v39, %v545_v24 }
 0x2aa   : > { %738 = vmatmul.f32.gmra.mxu0 %v661_v60 }
 0x2ab   : > { %v626_v49 = vpop.f32.mrf.mxu3 }
 0x2ac   : > { %v627_v44 = vadd.f32 %v2135_v41, %v626_v49  ;;  %v804_v49 = vld [vmem:[%s2248_s10 + $0x28] sm:$0xff] }
 0x2ae   : > { %v646_v19 = vmax.f32 %v627_v44, 0.0 }
 0x2b0   : > { %v662_v2 = vadd.f32 %v646_v19, %v546_v53 }
 0x2b2   : > { %741 = vmatmul.f32.gmra.mxu0 %v662_v2  ;;  %v1393_v2 = vld [vmem:[%s2485_s2 + $0x350] sm:$0xff] }
 0x2b3   : > { %v629_v6 = vpop.f32.mrf.mxu3  ;;  %971 = vmatpush.msrb.mxu2 %v1393_v2 }
 0x2b4   : > { %v630_v13 = vadd.f32 %v2135_v41, %v629_v6  ;;  %v1392_v6 = vld [vmem:[%s2485_s2 + $0x348] sm:$0xff] }
 0x2b5   : > { %972 = vmatpush.msrb.mxu2 %v1392_v6  ;;  %v811_v6 = vld [vmem:[%s2248_s10 + $0x60] sm:$0xff] }
 0x2b6   : > { %v647_v23 = vmax.f32 %v630_v13, 0.0 }
 0x2b8   : > { %v663_v24 = vadd.f32 %v647_v23, %v547_v34 }
 0x2ba   : > { %744 = vmatmul.f32.gmra.mxu0 %v663_v24 }
 0x2bf   : > { %v700_v33 = vpop.f32.mrf.mxu0 }
 0x2c0   : > { %v701_v29 = vadd.f32 %v2237_v31, %v700_v33 }
 0x2c2   : > { %v751_v53 = vmul.f32 0.5, %v701_v29  ;;  %1399 = vst [vmem:[%s2240_s8 + $0x80] sm:$0xff] %v701_v29 }
 0x2c4   : > { %v767_v41 = vmul.f32 1.442695, %v751_v53 }
 0x2c6   : > { %1500 = vpow2.f32 %v767_v41 }
 0x2c7   : > { %v703_v34 = vpop.f32.mrf.mxu0 }
 0x2c8   : > { %v704_v9 = vadd.f32 %v2237_v31, %v703_v34  ;;  %v1391_v34 = vld [vmem:[%s2485_s2 + $0x340] sm:$0xff] }
 0x2c9   : > { %973 = vmatpush.msrb.mxu2 %v1391_v34 }
 0x2ca   : > { %v752_v62 = vmul.f32 0.5, %v704_v9  ;;  %1400 = vst [vmem:[%s2240_s8 + $0x88] sm:$0xff] %v704_v9 }
 0x2cc   : > { %v1501_v12 = vpop.eup %1500  ;;  %v769_v15 = vmul.f32 1.442695, %v752_v62 }
 0x2cd   : > { %v815_v36 = vmul.f32 %v1501_v12, %v799_v16 }
 0x2ce   : > { %1502 = vpow2.f32 %v769_v15  ;;  %v806_v15 = vld [vmem:[%s2248_s10 + $0x38] sm:$0xff] }
 0x2cf   : > { %v706_v37 = vpop.f32.mrf.mxu0  ;;  %v831_v20 = vsel %vm750_vm0, %v701_v29, %v815_v36  ;;  %v805_v29 = vld [vmem:[%s2248_s10 + $0x30] sm:$0xff] }
 0x2d0   : > { %v707_v18 = vadd.f32 %v2237_v31, %v706_v37  ;;  %882 = vmatmul.f32.vlgmr.msrb.gmra.mxu1 %v831_v20 }
 0x2d2   : > { %v753_v21 = vmul.f32 0.5, %v707_v18  ;;  %1401 = vst [vmem:[%s2240_s8 + $0x90] sm:$0xff] %v707_v18 }
 0x2d4   : > { %v1503_v22 = vpop.eup %1502  ;;  %v771_v25 = vmul.f32 1.442695, %v753_v21 }
 0x2d5   : > { %v816_v40 = vmul.f32 %v1503_v22, %v800_v51 }
 0x2d6   : > { %1504 = vpow2.f32 %v771_v25 }
 0x2d7   : > { %v709_v27 = vpop.f32.mrf.mxu0  ;;  %v832_v4 = vsel %vm750_vm0, %v704_v9, %v816_v40  ;;  %v807_v40 = vld [vmem:[%s2248_s10 + $0x40] sm:$0xff] }
 0x2d8   : > { %v710_v43 = vadd.f32 %v2237_v31, %v709_v27  ;;  %885 = vmatmul.f32.gmra.mxu1 %v832_v4 }
 0x2da   : > { %v754_v26 = vmul.f32 0.5, %v710_v43  ;;  %1402 = vst [vmem:[%s2240_s8 + $0x98] sm:$0xff] %v710_v43 }
 0x2dc   : > { %v1505_v55 = vpop.eup %1504  ;;  %v773_v3 = vmul.f32 1.442695, %v754_v26  ;;  %v1388_v26 = vld [vmem:[%s2485_s2 + $0x328] sm:$0xff] }
 0x2dd   : > { %v817_v46 = vmul.f32 %v1505_v55, %v801_v28 }
 0x2de   : > { %1506 = vpow2.f32 %v773_v3 }
 0x2df   : > { %v712_v35 = vpop.f32.mrf.mxu0  ;;  %v833_v7 = vsel %vm750_vm0, %v707_v18, %v817_v46  ;;  %v1390_v18 = vld [vmem:[%s2485_s2 + $0x338] sm:$0xff] }
 0x2e0   : > { %v713_v47 = vadd.f32 %v2237_v31, %v712_v35  ;;  %888 = vmatmul.f32.gmra.mxu1 %v833_v7  ;;  %974 = vmatpush.msrb.mxu2 %v1390_v18 }
 0x2e2   : > { %v755_v59 = vmul.f32 0.5, %v713_v47  ;;  %1403 = vst [vmem:[%s2240_s8 + $0xa0] sm:$0xff] %v713_v47 }
 0x2e4   : > { %v1507_v63 = vpop.eup %1506  ;;  %v775_v48 = vmul.f32 1.442695, %v755_v59 }
 0x2e5   : > { %v818_v52 = vmul.f32 %v1507_v63, %v802_v32 }
 0x2e6   : > { %1508 = vpow2.f32 %v775_v48 }
 0x2e7   : > { %v715_v1 = vpop.f32.mrf.mxu0  ;;  %v834_v5 = vsel %vm750_vm0, %v710_v43, %v818_v52  ;;  %v1389_v43 = vld [vmem:[%s2485_s2 + $0x330] sm:$0xff] }
 0x2e8   : > { %v716_v58 = vadd.f32 %v2237_v31, %v715_v1  ;;  %891 = vmatmul.f32.gmra.mxu1 %v834_v5  ;;  %975 = vmatpush.msrb.mxu2 %v1389_v43  ;;  %v809_v52 = vld [vmem:[%s2248_s10 + $0x50] sm:$0xff] }
 0x2ea   : > { %v756_v0 = vmul.f32 0.5, %v716_v58  ;;  %1404 = vst [vmem:[%s2240_s8 + $0xa8] sm:$0xff] %v716_v58  ;;  %976 = vmatpush.msrb.mxu2 %v1388_v26 }
 0x2ec   : > { %v1509_v10 = vpop.eup %1508  ;;  %v777_v11 = vmul.f32 1.442695, %v756_v0 }
 0x2ed   : > { %v819_v57 = vmul.f32 %v1509_v10, %v803_v8 }
 0x2ee   : > { %1510 = vpow2.f32 %v777_v11  ;;  %v1385_v11 = vld [vmem:[%s2485_s2 + $0x310] sm:$0xff] }
 0x2ef   : > { %v718_v17 = vpop.f32.mrf.mxu0  ;;  %v835_v39 = vsel %vm750_vm0, %v713_v47, %v819_v57  ;;  %v1387_v47 = vld [vmem:[%s2485_s2 + $0x320] sm:$0xff]  ;;  %v1384_v57 = vld [vmem:[%s2485_s2 + $0x308] sm:$0xff] }
 0x2f0   : > { %v719_v54 = vadd.f32 %v2237_v31, %v718_v17  ;;  %894 = vmatmul.f32.gmra.mxu1 %v835_v39  ;;  %977 = vmatpush.msrb.mxu2 %v1387_v47  ;;  %v810_v17 = vld [vmem:[%s2248_s10 + $0x58] sm:$0xff] }
 0x2f2   : > { %v757_v60 = vmul.f32 0.5, %v719_v54  ;;  %1405 = vst [vmem:[%s2240_s8 + $0xb0] sm:$0xff] %v719_v54 }
 0x2f4   : > { %v1511_v44 = vpop.eup %1510  ;;  %v779_v19 = vmul.f32 1.442695, %v757_v60 }
 0x2f5   : > { %v820_v50 = vmul.f32 %v1511_v44, %v804_v49 }
 0x2f6   : > { %1512 = vpow2.f32 %v779_v19 }
 0x2f7   : > { %v721_v13 = vpop.f32.mrf.mxu0  ;;  %v836_v23 = vsel %vm750_vm0, %v716_v58, %v820_v50  ;;  %v1386_v58 = vld [vmem:[%s2485_s2 + $0x318] sm:$0xff]  ;;  %v1383_v50 = vld [vmem:[%s2485_s2 + $0x300] sm:$0xff] }
 0x2f8   : > { %v722_v24 = vadd.f32 %v2237_v31, %v721_v13  ;;  %897 = vmatmul.f32.gmra.mxu1 %v836_v23  ;;  %978 = vmatpush.msrb.mxu2 %v1386_v58 }
 0x2fa   : > { %v758_v33 = vmul.f32 0.5, %v722_v24  ;;  %1406 = vst [vmem:[%s2240_s8 + $0xb8] sm:$0xff] %v722_v24  ;;  %979 = vmatpush.msrb.mxu2 %v1385_v11 }
 0x2fc   : > { %v1513_v53 = vpop.eup %1512  ;;  %v781_v41 = vmul.f32 1.442695, %v758_v33  ;;  %980 = vmatpush.msrb.mxu2 %v1384_v57 }
 0x2fd   : > { %v821_v56 = vmul.f32 %v1513_v53, %v805_v29 }
 0x2fe   : > { %1514 = vpow2.f32 %v781_v41  ;;  %981 = vmatpush.msrb.mxu2 %v1383_v50 }
 0x2ff   : > { %v724_v9 = vpop.f32.mrf.mxu0  ;;  %v837_v62 = vsel %vm750_vm0, %v719_v54, %v821_v56  ;;  %v812_v56 = vld [vmem:[%s2248_s10 + $0x68] sm:$0xff] }
 0x300   : > { %v725_v16 = vadd.f32 %v2237_v31, %v724_v9  ;;  %900 = vmatmul.f32.gmra.mxu1 %v837_v62 }
 0x302   : > { %v759_v12 = vmul.f32 0.5, %v725_v16  ;;  %1407 = vst [vmem:[%s2240_s8 + $0xc0] sm:$0xff] %v725_v16 }
 0x304   : > { %v1515_v36 = vpop.eup %1514  ;;  %v783_v37 = vmul.f32 1.442695, %v759_v12 }
 0x305   : > { %v822_v20 = vmul.f32 %v1515_v36, %v806_v15 }
 0x306   : > { %1516 = vpow2.f32 %v783_v37  ;;  %v813_v37 = vld [vmem:[%s2248_s10 + $0x70] sm:$0xff] }
 0x307   : > { %v727_v21 = vpop.f32.mrf.mxu0  ;;  %v838_v51 = vsel %vm750_vm0, %v722_v24, %v822_v20 }
 0x308   : > { %v728_v22 = vadd.f32 %v2237_v31, %v727_v21  ;;  %903 = vmatmul.f32.gmra.mxu1 %v838_v51 }
 0x30a   : > { %v760_v25 = vmul.f32 0.5, %v728_v22  ;;  %1408 = vst [vmem:[%s2240_s8 + $0xc8] sm:$0xff] %v728_v22 }
 0x30c   : > { %v1517_v42 = vpop.eup %1516  ;;  %v785_v27 = vmul.f32 1.442695, %v760_v25 }
 0x30d   : > { %v823_v4 = vmul.f32 %v1517_v42, %v807_v40 }
 0x30e   : > { %1518 = vpow2.f32 %v785_v27 }
 0x30f   : > { %v730_v28 = vpop.f32.mrf.mxu0  ;;  %v839_v55 = vsel %vm750_vm0, %v725_v16, %v823_v4 }
 0x310   : > { %v731_v3 = vadd.f32 %v2237_v31, %v730_v28  ;;  %906 = vmatmul.f32.gmra.mxu1 %v839_v55 }
 0x312   : > { %v761_v46 = vmul.f32 0.5, %v731_v3  ;;  %1409 = vst [vmem:[%s2240_s8 + $0xd0] sm:$0xff] %v731_v3 }
 0x314   : > { %v1519_v30 = vpop.eup %1518  ;;  %v787_v35 = vmul.f32 1.442695, %v761_v46 }
 0x315   : > { %v824_v7 = vmul.f32 %v1519_v30, %v808_v45 }
 0x316   : > { %1520 = vpow2.f32 %v787_v35 }
 0x317   : > { %v733_v59 = vpop.f32.mrf.mxu0  ;;  %v840_v32 = vsel %vm750_vm0, %v728_v22, %v824_v7  ;;  %v814_v22 = vld [vmem:[%s2248_s10 + $0x78] sm:$0xff] }
 0x318   : > { %v734_v63 = vadd.f32 %v2237_v31, %v733_v59  ;;  %909 = vmatmul.f32.gmra.mxu1 %v840_v32 }
 0x31a   : > { %v762_v48 = vmul.f32 0.5, %v734_v63  ;;  %1410 = vst [vmem:[%s2240_s8 + $0xd8] sm:$0xff] %v734_v63 }
 0x31c   : > { %v1521_v38 = vpop.eup %1520  ;;  %v789_v1 = vmul.f32 1.442695, %v762_v48 }
 0x31d   : > { %v825_v5 = vmul.f32 %v1521_v38, %v809_v52 }
 0x31e   : > { %1522 = vpow2.f32 %v789_v1 }
 0x31f   : > { %v736_v0 = vpop.f32.mrf.mxu0  ;;  %v841_v8 = vsel %vm750_vm0, %v731_v3, %v825_v5 }
 0x320   : > { %v737_v10 = vadd.f32 %v2237_v31, %v736_v0  ;;  %912 = vmatmul.f32.gmra.mxu1 %v841_v8 }
 0x322   : > { %v763_v14 = vmul.f32 0.5, %v737_v10  ;;  %1411 = vst [vmem:[%s2240_s8 + $0xe0] sm:$0xff] %v737_v10 }
 0x324   : > { %v1523_v39 = vpop.eup %1522  ;;  %v791_v54 = vmul.f32 1.442695, %v763_v14 }
 0x325   : > { %v826_v60 = vmul.f32 %v1523_v39, %v810_v17 }
 0x326   : > { %1524 = vpow2.f32 %v791_v54 }
 0x327   : > { %v739_v49 = vpop.f32.mrf.mxu0  ;;  %v842_v44 = vsel %vm750_vm0, %v734_v63, %v826_v60 }
 0x328   : > { %v740_v19 = vadd.f32 %v2237_v31, %v739_v49  ;;  %915 = vmatmul.f32.gmra.mxu1 %v842_v44 }
 0x32a   : > { %v764_v2 = vmul.f32 0.5, %v740_v19  ;;  %1412 = vst [vmem:[%s2240_s8 + $0xe8] sm:$0xff] %v740_v19 }
 0x32c   : > { %v1525_v13 = vpop.eup %1524  ;;  %v793_v23 = vmul.f32 1.442695, %v764_v2 }
 0x32d   : > { %v827_v24 = vmul.f32 %v1525_v13, %v811_v6 }
 0x32e   : > { %1526 = vpow2.f32 %v793_v23 }
 0x32f   : > { %v742_v33 = vpop.f32.mrf.mxu0  ;;  %v843_v29 = vsel %vm750_vm0, %v737_v10, %v827_v24 }
 0x330   : > { %v743_v53 = vadd.f32 %v2237_v31, %v742_v33  ;;  %918 = vmatmul.f32.gmra.mxu1 %v843_v29 }
 0x332   : > { %v765_v41 = vmul.f32 0.5, %v743_v53  ;;  %1413 = vst [vmem:[%s2240_s8 + $0xf0] sm:$0xff] %v743_v53 }
 0x334   : > { %v1527_v34 = vpop.eup %1526  ;;  %v795_v9 = vmul.f32 1.442695, %v765_v41 }
 0x335   : > { %v828_v62 = vmul.f32 %v1527_v34, %v812_v56 }
 0x336   : > { %1528 = vpow2.f32 %v795_v9  ;;  %v1499_v9 = vld [vmem:[%s2486_s3 + $0x6] ss:$0 sm:$0xff] }
 0x337   : > { %v745_v16 = vpop.f32.mrf.mxu0  ;;  %v844_v12 = vsel %vm750_vm0, %v740_v19, %v828_v62 }
 0x338   : > { %v746_v15 = vadd.f32 %v2237_v31, %v745_v16  ;;  %921 = vmatmul.f32.gmra.mxu1 %v844_v12  ;;  %v1498_v31 = vld [vmem:[%s2486_s3 + $0x5] ss:$0 sm:$0xff] }
 0x33a   : > { %v766_v36 = vmul.f32 0.5, %v746_v15  ;;  %1414 = vst [vmem:[%s2240_s8 + $0xf8] sm:$0xff] %v746_v15 }
 0x33c   : > { %v1529_v20 = vpop.eup %1528  ;;  %v797_v18 = vmul.f32 1.442695, %v766_v36 }
 0x33d   : > { %v829_v21 = vmul.f32 %v1529_v20, %v813_v37 }
 0x33e   : > { %1530 = vpow2.f32 %v797_v18 }
 0x33f   : > { %v845_v51 = vsel %vm750_vm0, %v743_v53, %v829_v21 }
 0x340   : > { %924 = vmatmul.f32.gmra.mxu1 %v845_v51 }
 0x344   : > { %v1531_v25 = vpop.eup %1530 }
 0x345   : > { %v830_v40 = vmul.f32 %v1531_v25, %v814_v22 }
 0x347   : > { %v846_v42 = vsel %vm750_vm0, %v746_v15, %v830_v40 }
 0x348   : > { %927 = vmatmul.f32.gmra.mxu1 %v846_v42 }
 0x34d   : > { %v883_v27 = vpop.f32.mrf.mxu1 }
 0x34e   : > { %v884_v4 = vadd.f32 %v1498_v31, %v883_v27 }
 0x350   : > { %v931_v43 = vmax.f32 %v884_v4, 0.0 }
 0x352   : > { %982 = vmatmul.f32.vlgmr.msrb.gmra.mxu2 %v931_v43 }
 0x355   : > { %v886_v26 = vpop.f32.mrf.mxu1 }
 0x356   : > { %v887_v28 = vadd.f32 %v1498_v31, %v886_v26 }
 0x358   : > { %v932_v55 = vmax.f32 %v887_v28, 0.0 }
 0x35a   : > { %985 = vmatmul.f32.gmra.mxu2 %v932_v55 }
 0x35d   : > { %v889_v3 = vpop.f32.mrf.mxu1 }
 0x35e   : > { %v890_v46 = vadd.f32 %v1498_v31, %v889_v3 }
 0x360   : > { %v933_v45 = vmax.f32 %v890_v46, 0.0 }
 0x362   : > { %988 = vmatmul.f32.gmra.mxu2 %v933_v45 }
 0x365   : > { %v892_v30 = vpop.f32.mrf.mxu1 }
 0x366   : > { %v893_v61 = vadd.f32 %v1498_v31, %v892_v30 }
 0x368   : > { %v934_v35 = vmax.f32 %v893_v61, 0.0 }
 0x36a   : > { %991 = vmatmul.f32.gmra.mxu2 %v934_v35 }
 0x36d   : > { %v895_v7 = vpop.f32.mrf.mxu1 }
 0x36e   : > { %v896_v47 = vadd.f32 %v1498_v31, %v895_v7 }
 0x370   : > { %v935_v59 = vmax.f32 %v896_v47, 0.0 }
 0x372   : > { %994 = vmatmul.f32.gmra.mxu2 %v935_v59 }
 0x375   : > { %v898_v32 = vpop.f32.mrf.mxu1 }
 0x376   : > { %v899_v63 = vadd.f32 %v1498_v31, %v898_v32 }
 0x378   : > { %v936_v48 = vmax.f32 %v899_v63, 0.0 }
 0x37a   : > { %997 = vmatmul.f32.gmra.mxu2 %v936_v48 }
 0x37d   : > { %v901_v52 = vpop.f32.mrf.mxu1 }
 0x37e   : > { %v902_v38 = vadd.f32 %v1498_v31, %v901_v52 }
 0x380   : > { %v937_v1 = vmax.f32 %v902_v38, 0.0 }
 0x382   : > { %1000 = vmatmul.f32.gmra.mxu2 %v937_v1 }
 0x385   : > { %v904_v5 = vpop.f32.mrf.mxu1 }
 0x386   : > { %v905_v58 = vadd.f32 %v1498_v31, %v904_v5 }
 0x388   : > { %v938_v0 = vmax.f32 %v905_v58, 0.0 }
 0x38a   : > { %1003 = vmatmul.f32.gmra.mxu2 %v938_v0 }
 0x38d   : > { %v907_v8 = vpop.f32.mrf.mxu1 }
 0x38e   : > { %v908_v10 = vadd.f32 %v1498_v31, %v907_v8 }
 0x390   : > { %v939_v11 = vmax.f32 %v908_v10, 0.0 }
 0x392   : > { %1006 = vmatmul.f32.gmra.mxu2 %v939_v11 }
 0x395   : > { %v910_v57 = vpop.f32.mrf.mxu1 }
 0x396   : > { %v911_v14 = vadd.f32 %v1498_v31, %v910_v57 }
 0x398   : > { %v940_v17 = vmax.f32 %v911_v14, 0.0 }
 0x39a   : > { %1009 = vmatmul.f32.gmra.mxu2 %v940_v17 }
 0x39d   : > { %v913_v39 = vpop.f32.mrf.mxu1 }
 0x39e   : > { %v914_v54 = vadd.f32 %v1498_v31, %v913_v39 }
 0x3a0   : > { %v941_v60 = vmax.f32 %v914_v54, 0.0 }
 0x3a2   : > { %1012 = vmatmul.f32.gmra.mxu2 %v941_v60 }
 0x3a5   : > { %v916_v49 = vpop.f32.mrf.mxu1 }
 0x3a6   : > { %v917_v44 = vadd.f32 %v1498_v31, %v916_v49  ;;  %v1196_v49 = vld [vmem:[%s2240_s8 + $0x80] sm:$0xff] (%p1606_p4) }
 0x3a7   : > { %1197 = vst [vmem:[%s2409_s14 + $0x100] sm:$0xff] (%p1606_p4), %v1196_v49 }
 0x3a8   : > { %v942_v19 = vmax.f32 %v917_v44, 0.0  ;;  %v1198_v44 = vld [vmem:[%s2240_s8 + $0x88] sm:$0xff] (%p1606_p4) }
 0x3a9   : > { %1199 = vst [vmem:[%s2409_s14 + $0x108] sm:$0xff] (%p1606_p4), %v1198_v44 }
 0x3aa   : > { %1015 = vmatmul.f32.gmra.mxu2 %v942_v19  ;;  %v1200_v19 = vld [vmem:[%s2240_s8 + $0x90] sm:$0xff] (%p1606_p4) }
 0x3ab   : > { %1201 = vst [vmem:[%s2409_s14 + $0x110] sm:$0xff] (%p1606_p4), %v1200_v19 }
 0x3ad   : > { %v919_v50 = vpop.f32.mrf.mxu1 }
 0x3ae   : > { %v920_v2 = vadd.f32 %v1498_v31, %v919_v50  ;;  %v1202_v50 = vld [vmem:[%s2240_s8 + $0x98] sm:$0xff] (%p1606_p4) }
 0x3af   : > { %1203 = vst [vmem:[%s2409_s14 + $0x118] sm:$0xff] (%p1606_p4), %v1202_v50 }
 0x3b0   : > { %v943_v6 = vmax.f32 %v920_v2, 0.0  ;;  %v1204_v2 = vld [vmem:[%s2240_s8 + $0xa0] sm:$0xff] (%p1606_p4) }
 0x3b1   : > { %1205 = vst [vmem:[%s2409_s14 + $0x120] sm:$0xff] (%p1606_p4), %v1204_v2 }
 0x3b2   : > { %1018 = vmatmul.f32.gmra.mxu2 %v943_v6  ;;  %v1206_v6 = vld [vmem:[%s2240_s8 + $0xa8] sm:$0xff] (%p1606_p4) }
 0x3b3   : > { %1207 = vst [vmem:[%s2409_s14 + $0x128] sm:$0xff] (%p1606_p4), %v1206_v6 }
 0x3b5   : > { %v922_v13 = vpop.f32.mrf.mxu1 }
 0x3b6   : > { %v923_v23 = vadd.f32 %v1498_v31, %v922_v13  ;;  %v1208_v13 = vld [vmem:[%s2240_s8 + $0xb0] sm:$0xff] (%p1606_p4) }
 0x3b7   : > { %1209 = vst [vmem:[%s2409_s14 + $0x130] sm:$0xff] (%p1606_p4), %v1208_v13 }
 0x3b8   : > { %v944_v24 = vmax.f32 %v923_v23, 0.0  ;;  %v1210_v23 = vld [vmem:[%s2240_s8 + $0xb8] sm:$0xff] (%p1606_p4) }
 0x3b9   : > { %1211 = vst [vmem:[%s2409_s14 + $0x138] sm:$0xff] (%p1606_p4), %v1210_v23 }
 0x3ba   : > { %1021 = vmatmul.f32.gmra.mxu2 %v944_v24  ;;  %v1212_v24 = vld [vmem:[%s2240_s8 + $0xc0] sm:$0xff] (%p1606_p4) }
 0x3bb   : > { %1213 = vst [vmem:[%s2409_s14 + $0x140] sm:$0xff] (%p1606_p4), %v1212_v24 }
 0x3bd   : > { %v925_v33 = vpop.f32.mrf.mxu1 }
 0x3be   : > { %v926_v29 = vadd.f32 %v1498_v31, %v925_v33  ;;  %v1214_v33 = vld [vmem:[%s2240_s8 + $0xc8] sm:$0xff] (%p1606_p4) }
 0x3bf   : > { %1215 = vst [vmem:[%s2409_s14 + $0x148] sm:$0xff] (%p1606_p4), %v1214_v33 }
 0x3c0   : > { %v945_v53 = vmax.f32 %v926_v29, 0.0  ;;  %v1216_v29 = vld [vmem:[%s2240_s8 + $0xd0] sm:$0xff] (%p1606_p4) }
 0x3c1   : > { %1217 = vst [vmem:[%s2409_s14 + $0x150] sm:$0xff] (%p1606_p4), %v1216_v29 }
 0x3c2   : > { %1024 = vmatmul.f32.gmra.mxu2 %v945_v53  ;;  %v1218_v53 = vld [vmem:[%s2240_s8 + $0xd8] sm:$0xff] (%p1606_p4) }
 0x3c3   : > { %1219 = vst [vmem:[%s2409_s14 + $0x158] sm:$0xff] (%p1606_p4), %v1218_v53 }
 0x3c5   : > { %v928_v41 = vpop.f32.mrf.mxu1 }
 0x3c6   : > { %v929_v56 = vadd.f32 %v1498_v31, %v928_v41  ;;  %v1220_v41 = vld [vmem:[%s2240_s8 + $0xe0] sm:$0xff] (%p1606_p4) }
 0x3c7   : > { %1221 = vst [vmem:[%s2409_s14 + $0x160] sm:$0xff] (%p1606_p4), %v1220_v41 }
 0x3c8   : > { %v946_v34 = vmax.f32 %v929_v56, 0.0  ;;  %v1222_v56 = vld [vmem:[%s2240_s8 + $0xe8] sm:$0xff] (%p1606_p4) }
 0x3c9   : > { %1223 = vst [vmem:[%s2409_s14 + $0x168] sm:$0xff] (%p1606_p4), %v1222_v56 }
 0x3ca   : > { %1027 = vmatmul.f32.gmra.mxu2 %v946_v34  ;;  %v1224_v34 = vld [vmem:[%s2240_s8 + $0xf0] sm:$0xff] (%p1606_p4) }
 0x3cb   : > { %1225 = vst [vmem:[%s2409_s14 + $0x170] sm:$0xff] (%p1606_p4), %v1224_v34 }
 0x3d5   : > { %v983_v62 = vpop.f32.mrf.mxu2 }
 0x3d6   : > { %v984_v16 = vadd.f32 %v1499_v9, %v983_v62 }
 0x3d8   : > { %1031 = vst [vmem:[%s2240_s8] sm:$0xff] %v984_v16 }
 0x3dd   : > { %v986_v12 = vpop.f32.mrf.mxu2 }
 0x3de   : > { %v987_v15 = vadd.f32 %v1499_v9, %v986_v12 }
 0x3df   : > { %v1164_v48 = vld [vmem:[%s2240_s8] sm:$0xff] (%p1606_p4) }
 0x3e0   : > { %1032 = vst [vmem:[%s2240_s8 + $0x8] sm:$0xff] %v987_v15 }
 0x3e1   : > { %1165 = vst [vmem:[%s2409_s14] sm:$0xff] (%p1606_p4), %v1164_v48 }
 0x3e5   : > { %v989_v36 = vpop.f32.mrf.mxu2 }
 0x3e6   : > { %v990_v37 = vadd.f32 %v1499_v9, %v989_v36 }
 0x3e7   : > { %v1166_v52 = vld [vmem:[%s2240_s8 + $0x8] sm:$0xff] (%p1606_p4) }
 0x3e8   : > { %1033 = vst [vmem:[%s2240_s8 + $0x10] sm:$0xff] %v990_v37 }
 0x3e9   : > { %1167 = vst [vmem:[%s2409_s14 + $0x8] sm:$0xff] (%p1606_p4), %v1166_v52 }
 0x3ed   : > { %v992_v20 = vpop.f32.mrf.mxu2 }
 0x3ee   : > { %v993_v18 = vadd.f32 %v1499_v9, %v992_v20 }
 0x3ef   : > { %v1168_v38 = vld [vmem:[%s2240_s8 + $0x10] sm:$0xff] (%p1606_p4) }
 0x3f0   : > { %1034 = vst [vmem:[%s2240_s8 + $0x18] sm:$0xff] %v993_v18 }
 0x3f1   : > { %1169 = vst [vmem:[%s2409_s14 + $0x10] sm:$0xff] (%p1606_p4), %v1168_v38 }
 0x3f5   : > { %v995_v21 = vpop.f32.mrf.mxu2 }
 0x3f6   : > { %v996_v51 = vadd.f32 %v1499_v9, %v995_v21 }
 0x3f7   : > { %v1170_v1 = vld [vmem:[%s2240_s8 + $0x18] sm:$0xff] (%p1606_p4) }
 0x3f8   : > { %1035 = vst [vmem:[%s2240_s8 + $0x20] sm:$0xff] %v996_v51 }
 0x3f9   : > { %1171 = vst [vmem:[%s2409_s14 + $0x18] sm:$0xff] (%p1606_p4), %v1170_v1 }
 0x3fd   : > { %v998_v22 = vpop.f32.mrf.mxu2 }
 0x3fe   : > { %v999_v25 = vadd.f32 %v1499_v9, %v998_v22 }
 0x3ff   : > { %v1172_v5 = vld [vmem:[%s2240_s8 + $0x20] sm:$0xff] (%p1606_p4) }
 0x400   : > { %1036 = vst [vmem:[%s2240_s8 + $0x28] sm:$0xff] %v999_v25 }
 0x401   : > { %1173 = vst [vmem:[%s2409_s14 + $0x20] sm:$0xff] (%p1606_p4), %v1172_v5 }
 0x405   : > { %v1001_v40 = vpop.f32.mrf.mxu2 }
 0x406   : > { %v1002_v42 = vadd.f32 %v1499_v9, %v1001_v40 }
 0x407   : > { %v1174_v58 = vld [vmem:[%s2240_s8 + $0x28] sm:$0xff] (%p1606_p4) }
 0x408   : > { %1037 = vst [vmem:[%s2240_s8 + $0x30] sm:$0xff] %v1002_v42 }
 0x409   : > { %1175 = vst [vmem:[%s2409_s14 + $0x28] sm:$0xff] (%p1606_p4), %v1174_v58 }
 0x40d   : > { %v1004_v31 = vpop.f32.mrf.mxu2 }
 0x40e   : > { %v1005_v27 = vadd.f32 %v1499_v9, %v1004_v31 }
 0x40f   : > { %v1176_v0 = vld [vmem:[%s2240_s8 + $0x30] sm:$0xff] (%p1606_p4) }
 0x410   : > { %1038 = vst [vmem:[%s2240_s8 + $0x38] sm:$0xff] %v1005_v27 }
 0x411   : > { %1177 = vst [vmem:[%s2409_s14 + $0x30] sm:$0xff] (%p1606_p4), %v1176_v0 }
 0x415   : > { %v1007_v4 = vpop.f32.mrf.mxu2 }
 0x416   : > { %v1008_v43 = vadd.f32 %v1499_v9, %v1007_v4 }
 0x417   : > { %v1178_v8 = vld [vmem:[%s2240_s8 + $0x38] sm:$0xff] (%p1606_p4) }
 0x418   : > { %1039 = vst [vmem:[%s2240_s8 + $0x40] sm:$0xff] %v1008_v43 }
 0x419   : > { %1179 = vst [vmem:[%s2409_s14 + $0x38] sm:$0xff] (%p1606_p4), %v1178_v8 }
 0x41d   : > { %v1010_v26 = vpop.f32.mrf.mxu2 }
 0x41e   : > { %v1011_v28 = vadd.f32 %v1499_v9, %v1010_v26 }
 0x41f   : > { %v1180_v10 = vld [vmem:[%s2240_s8 + $0x40] sm:$0xff] (%p1606_p4) }
 0x420   : > { %1040 = vst [vmem:[%s2240_s8 + $0x48] sm:$0xff] %v1011_v28 }
 0x421   : > { %1181 = vst [vmem:[%s2409_s14 + $0x40] sm:$0xff] (%p1606_p4), %v1180_v10 }
 0x425   : > { %v1013_v55 = vpop.f32.mrf.mxu2 }
 0x426   : > { %v1014_v3 = vadd.f32 %v1499_v9, %v1013_v55 }
 0x427   : > { %v1182_v11 = vld [vmem:[%s2240_s8 + $0x48] sm:$0xff] (%p1606_p4) }
 0x428   : > { %1041 = vst [vmem:[%s2240_s8 + $0x50] sm:$0xff] %v1014_v3 }
 0x429   : > { %1183 = vst [vmem:[%s2409_s14 + $0x48] sm:$0xff] (%p1606_p4), %v1182_v11 }
 0x42d   : > { %v1016_v46 = vpop.f32.mrf.mxu2 }
 0x42e   : > { %v1017_v45 = vadd.f32 %v1499_v9, %v1016_v46 }
 0x42f   : > { %v1184_v57 = vld [vmem:[%s2240_s8 + $0x50] sm:$0xff] (%p1606_p4) }
 0x430   : > { %1042 = vst [vmem:[%s2240_s8 + $0x58] sm:$0xff] %v1017_v45 }
 0x431   : > { %1185 = vst [vmem:[%s2409_s14 + $0x50] sm:$0xff] (%p1606_p4), %v1184_v57 }
 0x435   : > { %v1019_v30 = vpop.f32.mrf.mxu2 }
 0x436   : > { %v1020_v61 = vadd.f32 %v1499_v9, %v1019_v30 }
 0x437   : > { %v1186_v14 = vld [vmem:[%s2240_s8 + $0x58] sm:$0xff] (%p1606_p4) }
 0x438   : > { %1043 = vst [vmem:[%s2240_s8 + $0x60] sm:$0xff] %v1020_v61 }
 0x439   : > { %1187 = vst [vmem:[%s2409_s14 + $0x58] sm:$0xff] (%p1606_p4), %v1186_v14 }
 0x43d   : > { %v1022_v35 = vpop.f32.mrf.mxu2 }
 0x43e   : > { %v1023_v7 = vadd.f32 %v1499_v9, %v1022_v35 }
 0x43f   : > { %v1188_v17 = vld [vmem:[%s2240_s8 + $0x60] sm:$0xff] (%p1606_p4) }
 0x440   : > { %1044 = vst [vmem:[%s2240_s8 + $0x68] sm:$0xff] %v1023_v7 }
 0x441   : > { %1189 = vst [vmem:[%s2409_s14 + $0x60] sm:$0xff] (%p1606_p4), %v1188_v17 }
 0x445   : > { %v1025_v47 = vpop.f32.mrf.mxu2 }
 0x446   : > { %v1026_v59 = vadd.f32 %v1499_v9, %v1025_v47 }
 0x447   : > { %v1190_v39 = vld [vmem:[%s2240_s8 + $0x68] sm:$0xff] (%p1606_p4) }
 0x448   : > { %1045 = vst [vmem:[%s2240_s8 + $0x70] sm:$0xff] %v1026_v59 }
 0x449   : > { %1191 = vst [vmem:[%s2409_s14 + $0x68] sm:$0xff] (%p1606_p4), %v1190_v39 }
 0x44c   : > { %1070 = sbr.rel (!%p1606_p4) target bundleno = 1113 (0x459), region = 40 }
 0x44d   : > { %v1028_v32 = vpop.f32.mrf.mxu2 }
 0x44e   : > { %v1029_v63 = vadd.f32 %v1499_v9, %v1028_v32  ;;  %v1226_v9 = vld [vmem:[%s2240_s8 + $0xf8] sm:$0xff] (%p1606_p4) }
 0x44f   : > { %v1192_v54 = vld [vmem:[%s2240_s8 + $0x70] sm:$0xff] (%p1606_p4)  ;;  %1227 = vst [vmem:[%s2409_s14 + $0x178] sm:$0xff] (%p1606_p4), %v1226_v9 }
 0x450   : > { %1046 = vst [vmem:[%s2240_s8 + $0x78] sm:$0xff] %v1029_v63 }
 0x451   : > { %1193 = vst [vmem:[%s2409_s14 + $0x70] sm:$0xff] %v1192_v54 }
 0x457   : > { %v1194_v60 = vld [vmem:[%s2240_s8 + $0x78] sm:$0xff] }
 0x458   : > { %1195 = vst [vmem:[%s2409_s14 + $0x78] sm:$0xff] %v1194_v60 }
 0x459 PF: > { %p11_p8 = scmp.ge.s32.totalorder %s1596_s19, 4   ;;  %s2489_s15 = smov %s1550_s16 }
 0x45a   : > { %s2490_s16 = smov %s1604_s22  ;;  %s2491_s17 = smov %s1596_s19 }
 0x45b   :  { %13 = sbr.rel (!%p11_p8) target bundleno = 2 (0x2), region = 114 }

</bundles_post_ra>
